<compile_context>
chip_gen: v5e
topology: v5e:2x2
jax: 0.10.0
libtpu: 0.0.40
codegen_flags: <defaults>
</compile_context>

<pallas_src>
import jax
import jax.numpy as jnp
from jax.experimental import pallas as pl
from jax.experimental.pallas import tpu as pltpu


# ----------------------------------------------------------------------------
# Per-generation VMEM budget (leave headroom for compiler internal scratch).
# ----------------------------------------------------------------------------
def _vmem_limit_bytes():
    cap = 128 * 1024 * 1024
    try:
        info = pltpu.get_tpu_info()
        cap = int(getattr(info, "vmem_capacity_bytes", cap)) or cap
    except Exception:
        pass
    # ~80% of physical: ~51 MiB on v7x (64 MiB/TC), ~102 MiB on v5e/v6e (128 MiB).
    return max(32 * 1024 * 1024, int(cap * 0.8))


# ----------------------------------------------------------------------------
# Frames-per-grid-step (TL): VMEM-budget-driven instead of "largest divisor of L".
# ----------------------------------------------------------------------------
def _select_tl_chunk(L, *, cin, cout, kl, frame_lanes, n_pad, ks, cbytes, obytes,
                     vmem_budget, tl_cap=8):
    fixed = (kl * 4 * cout * ks * cbytes                     # folded weights
             + 4 * cout * 4                                   # bias (f32)
             + 2 * (kl - 1) * cin * frame_lanes * cbytes)     # temporal-halo frames (x2 buffers)
    per_frame = (2 * cin * frame_lanes * cbytes               # streamed input window (x2 buffers)
                 + ks * n_pad * cbytes                        # im2col patch scratch
                 + 2 * 4 * cout * n_pad * obytes)             # output slab (x2 buffers)
    budget = int(vmem_budget * 0.7) - fixed                   # headroom for compiler scratch/vregs
    tl = budget // max(per_frame, 1)
    # TODO(synk): lift tl_cap (trace size / vreg pressure of the fully-unrolled im2col)
    #             via lax.fori_loop / manual streaming at production L.
    return int(max(1, min(tl, L, tl_cap)))


# ----------------------------------------------------------------------------
# Pallas kernel: one grid step = one batch x one TL-frame output chunk.
# ----------------------------------------------------------------------------
def _make_kernel(*, tl, kl, kh, kw, cin, n_valid, n_pad, wp, neg_slope):
    n_frames = tl + kl - 1
    ncols = tl * n_pad

    def kernel(x_ref, w_ref, b_ref, o_ref, patch_ref):
        # x_ref:     (1, 1, TL+KL-1, Cin, Hp*Wp)   L-window of flattened padded frames
        # w_ref:     (KL, 4*Cout, KH*KW*Cin)        per-temporal-tap folded phase weights
        # b_ref:     (4*Cout, 1)                    f32 bias replicated over the 4 phases
        # o_ref:     (1, 1, 4*Cout, TL*N_pad)       bf16, lane-dense, 128-aligned store
        # patch_ref: (KH*KW*Cin, (TL+KL-1)*N_pad)   spatial-only im2col scratch

        # 1) Spatial im2col.  Each frame is loaded ONCE; thanks to the stride-(Wp)
        #    flattening every (s,t) tap is a contiguous lane slice, written to a
        #    128-aligned column slab.  Columns [n_valid, n_pad) per frame stay
        #    uninitialized -- they only feed output columns the wrapper drops.
        for f in range(n_frames):
            frame = x_ref[0, 0, f]                           # (Cin, Hp*Wp)
            c0 = f * n_pad
            for s in range(kh):
                for t in range(kw):
                    k0 = (s * kw + t) * cin
                    off = s * wp + t
                    patch_ref[k0:k0 + cin, c0:c0 + n_valid] = (
                        frame[:, off:off + n_valid])

        # 2) Temporal contraction: one MXU dot per dl on a dl-shifted, 128-aligned
        #    column window of the SAME patch (no temporal rows in the patch).
        acc = jnp.dot(w_ref[0], patch_ref[:, :ncols],
                      preferred_element_type=jnp.float32)
        for dl in range(1, kl):
            acc += jnp.dot(w_ref[dl], patch_ref[:, dl * n_pad:dl * n_pad + ncols],
                           preferred_element_type=jnp.float32)

        # 3) f32 epilogue (bias + LeakyReLU), single lane-dense bf16 store.
        r = acc + b_ref[...]
        r = jnp.where(r >= 0, r, neg_slope * r)
        o_ref[0, 0] = r.astype(o_ref.dtype)

    return kernel


# ----------------------------------------------------------------------------
# Spectral norm (norm='SN'): divide the weight by its largest singular value.
# TODO(synk): PyTorch SN runs ONE power-iteration step per forward with a persistent
#             random `u` buffer; we use its converged fixed point.
# ----------------------------------------------------------------------------
def _spectral_normalize(weight_oidhw, n_iter=50):
    c_out = weight_oidhw.shape[0]
    w_mat = weight_oidhw.reshape(c_out, -1)
    u = jnp.ones((c_out,), jnp.float32)
    u = u / jnp.linalg.norm(u)

    def body(_, u):
        v = w_mat.T @ u
        v = v / (jnp.linalg.norm(v) + 1e-12)
        u = w_mat @ v
        u = u / (jnp.linalg.norm(u) + 1e-12)
        return u

    u = jax.lax.fori_loop(0, n_iter, body, u)
    v = w_mat.T @ u
    v = v / (jnp.linalg.norm(v) + 1e-12)
    sigma = u @ (w_mat @ v)
    return weight_oidhw / sigma


# ----------------------------------------------------------------------------
# Forward pass of VanillaDeconv
# ----------------------------------------------------------------------------
def vanilla_deconv_forward(x_ncdhw, weight_oidhw, bias, *, padding=1, dilation=1,
                           scale_factor=2, neg_slope=0.2,
                           compute_dtype=jnp.bfloat16, out_dtype=jnp.float32,
                           tl_chunk=None):
    x = jnp.asarray(x_ncdhw, jnp.float32)
    B, Cin, L, H, W = x.shape
    Cout, Cin_w, KL, KH, KW = weight_oidhw.shape
    assert Cin == Cin_w, "channel mismatch"
    assert (scale_factor, padding, dilation) == (2, 1, 1) and (KL, KH, KW) == (3, 3, 3), (
        "sub-pixel fast path implements the canonical VanillaDeconv config "
        "(scale_factor=2, kernel 3x3x3, padding=1, dilation=1)")

    # ---- weights: spectral norm + sub-pixel (depth-to-space) folding ---------------
    w_sn = _spectral_normalize(jnp.asarray(weight_oidhw, jnp.float32))
    # A[a, s, dh]: coefficient of padded-input row (i+s) for output row (2i+a), tap dh.
    A = jnp.array([[[1., 0., 0.], [0., 1., 1.], [0., 0., 0.]],
                   [[0., 0., 0.], [1., 1., 0.], [0., 0., 1.]]], jnp.float32)
    wf = jnp.einsum('ash,btw,oidhw->abodsti', A, A, w_sn)    # (2,2,Cout,KL,KH,KW,Cin)
    KS = KH * KW * Cin                                       # spatial-only contraction size
    # rows = (a,b,co) phase-major, cols = (s,t,ci); one (4*Cout, KS) matrix per dl.
    w_mat = jnp.transpose(wf, (3, 0, 1, 2, 4, 5, 6)).reshape(KL, 4 * Cout, KS)
    w_mat = w_mat.astype(compute_dtype)
    b_mat = jnp.tile(jnp.asarray(bias, jnp.float32), 4).reshape(4 * Cout, 1)

    # ---- geometry: pad at ORIGINAL resolution, lane-dense flattening ----------------
    Hp, Wp = H + 3, W + 2            # 1 top / 2 bottom rows, 1 left / 1 right col
    frame_lanes = Hp * Wp
    N = H * Wp                       # valid columns per frame (j >= W dropped later)
    N_pad = ((N + 127) // 128) * 128 # 128-lane-aligned per-frame column slab
    cbytes = jnp.dtype(compute_dtype).itemsize
    kernel_out_dtype = jnp.bfloat16  # halves HBM writeback + the pixel-shuffle read
    obytes = jnp.dtype(kernel_out_dtype).itemsize

    # ---- TL (frames per grid step): VMEM-budget-driven, per generation --------------
    vmem_limit = _vmem_limit_bytes()
    if tl_chunk is None:
        tl_chunk = _select_tl_chunk(L, cin=Cin, cout=Cout, kl=KL,
                                    frame_lanes=frame_lanes, n_pad=N_pad, ks=KS,
                                    cbytes=cbytes, obytes=obytes,
                                    vmem_budget=vmem_limit)
    TL = int(min(max(int(tl_chunk), 1), L))
    nL = int(pl.cdiv(L, TL))         # non-divisible L: last window zero-padded, extra
    TLK = TL + KL - 1                # output frames dropped in the wrapper
    TLN = TL * N_pad

    # ---- input: single pad at ORIGINAL resolution, flatten spatial onto lanes, build
    #      overlapping (TL+KL-1)-frame windows so only a small L-window is VMEM-resident
    #      per grid step (streamed by the BlockSpec pipeline).
    Lp_total = nL * TL + (KL - 1)
    xt = jnp.transpose(x, (0, 2, 1, 3, 4))                                 # (B, L, Cin, H, W)
    xp = jnp.pad(xt, ((0, 0), (1, Lp_total - L - 1), (0, 0), (1, 2), (1, 1)))
    x_flat = xp.reshape(B, Lp_total, Cin, frame_lanes).astype(compute_dtype)
    widx = (jnp.arange(nL) * TL)[:, None] + jnp.arange(TLK)[None, :]       # (nL, TLK)
    x_win = x_flat[:, widx]                                                # (B,nL,TLK,Cin,HpWp)

    kernel = _make_kernel(tl=TL, kl=KL, kh=KH, kw=KW, cin=Cin,
                          n_valid=N, n_pad=N_pad, wp=Wp, neg_slope=neg_slope)

    out_k = pl.pallas_call(
        kernel,
        out_shape=jax.ShapeDtypeStruct((B, nL, 4 * Cout, TLN), kernel_out_dtype),
        grid_spec=pltpu.PrefetchScalarGridSpec(
            num_scalar_prefetch=0,
            grid=(B, nL),            # both independent -> megacore-shardable on v7x
            in_specs=[
                pl.BlockSpec((1, 1, TLK, Cin, frame_lanes),
                             lambda b, l: (b, l, 0, 0, 0)),
                pl.BlockSpec((KL, 4 * Cout, KS), lambda b, l: (0, 0, 0)),
                pl.BlockSpec((4 * Cout, 1), lambda b, l: (0, 0)),
            ],
            out_specs=pl.BlockSpec((1, 1, 4 * Cout, TLN), lambda b, l: (b, l, 0, 0)),
            scratch_shapes=[pltpu.VMEM((KS, TLK * N_pad), compute_dtype)],
        ),
        compiler_params=pltpu.CompilerParams(
            dimension_semantics=("parallel", "parallel"),
            vmem_limit_bytes=vmem_limit),
    )(x_win, w_mat, b_mat)

    # ---- depth-to-space (pixel shuffle) + drop alignment / stride-padding columns ----
    out = out_k.reshape(B, nL, 2, 2, Cout, TL, N_pad)[..., :N]
    out = out.reshape(B, nL, 2, 2, Cout, TL, H, Wp)[..., :W]
    out = jnp.transpose(out, (0, 4, 1, 5, 6, 2, 7, 3))        # (B,Cout,nL,TL,H,2,W,2)
    out = out.reshape(B, Cout, nL * TL, 2 * H, 2 * W)[:, :, :L]
    return out.astype(out_dtype)


# ----------------------------------------------------------------------------
# Pure-JAX reference (nearest upsample + lax conv) for correctness checking
# ----------------------------------------------------------------------------
def _reference(x_ncdhw, weight_oidhw, bias, *, padding=1, dilation=1,
               scale_factor=2, neg_slope=0.2):
    x = jnp.asarray(x_ncdhw, jnp.float32)
    w_sn = _spectral_normalize(jnp.asarray(weight_oidhw, jnp.float32))
    w_knl = jnp.transpose(w_sn, (2, 3, 4, 1, 0))               # DHWIO
    x = jnp.transpose(x, (0, 2, 3, 4, 1))                      # NDHWC
    x = jnp.repeat(x, scale_factor, axis=2)
    x = jnp.repeat(x, scale_factor, axis=3)
    p = padding
    out = jax.lax.conv_general_dilated(
        x, w_knl, window_strides=(1, 1, 1),
        padding=((p, p), (p, p), (p, p)),
        rhs_dilation=(dilation,) * 3,
        dimension_numbers=("NDHWC", "DHWIO", "NDHWC"))
    out = out + jnp.asarray(bias, jnp.float32)
    out = jnp.where(out >= 0, out, neg_slope * out)
    return jnp.transpose(out, (0, 4, 1, 2, 3))                 # NCDHW


if __name__ == "__main__":
    # VanillaDeconv(in_channels=4, out_channels=8, kernel_size=3, padding=1,
    #               norm='SN', activation=LeakyReLU(0.2), scale_factor=2, conv_by='3d')
    Cout, K = 8, 3

    # Test 1: canonical small shape (budget-driven TL).
    B, Cin, L, H, W = 2, 4, 4, 8, 8
    kx, kw, kb = jax.random.split(jax.random.PRNGKey(0), 3)
    x = jax.random.normal(kx, (B, Cin, L, H, W), jnp.float32)
    weight = 0.1 * jax.random.normal(kw, (Cout, Cin, K, K, K), jnp.float32)
    bias = 0.1 * jax.random.normal(kb, (Cout,), jnp.float32)

    out = vanilla_deconv_forward(x, weight, bias)
    out = jax.block_until_ready(out)
    ref = _reference(x, weight, bias)
    assert out.shape == (B, Cout, L, 2 * H, 2 * W), out.shape
    # bf16 MXU operands / bf16 writeback -> tolerance loosened accordingly.
    assert jnp.allclose(out, ref, atol=3e-2, rtol=3e-2), float(jnp.max(jnp.abs(out - ref)))

    # Test 2: non-square H != W and L not divisible by the frame chunk.
    B2, Cin2, L2, H2, W2 = 1, 4, 3, 6, 10
    kx2, kw2, kb2 = jax.random.split(jax.random.PRNGKey(1), 3)
    x2 = jax.random.normal(kx2, (B2, Cin2, L2, H2, W2), jnp.float32)
    w2 = 0.1 * jax.random.normal(kw2, (Cout, Cin2, K, K, K), jnp.float32)
    b2 = 0.1 * jax.random.normal(kb2, (Cout,), jnp.float32)
    out2 = jax.block_until_ready(vanilla_deconv_forward(x2, w2, b2, tl_chunk=2))
    ref2 = _reference(x2, w2, b2)
    assert out2.shape == (B2, Cout, L2, 2 * H2, 2 * W2), out2.shape
    assert jnp.allclose(out2, ref2, atol=3e-2, rtol=3e-2), float(jnp.max(jnp.abs(out2 - ref2)))

    print("KERNEL_OK")
</pallas_src>

<mosaic_0001>
module attributes {stable_mosaic.version = 11 : i64} {
  func.func @kernel(%arg0: i32, %arg1: i32, %arg2: memref<1x1x6x4x110xbf16, #tpu.memory_space<vmem>>, %arg3: memref<3x32x36xbf16, #tpu.memory_space<vmem>>, %arg4: memref<32x1xf32, #tpu.memory_space<vmem>>, %arg5: memref<1x1x32x512xbf16, #tpu.memory_space<vmem>>, %arg6: memref<36x768xbf16, #tpu.memory_space<vmem>>) attributes {dimension_semantics = [#tpu.dimension_semantics<parallel>, #tpu.dimension_semantics<parallel>], iteration_bounds = array<i64: 2, 1>, scalar_prefetch = 0 : i64, scratch_operands = 1 : i64, tpu.core_type = #tpu.core_type<tc>, window_params = [{transform_indices = @transform_0, window_bounds = array<i64: 1, 1, 6, 4, 110>}, {pipeline_mode = #tpu.pipeline_mode<synchronous>, transform_indices = @transform_1, window_bounds = array<i64: 3, 32, 36>}, {pipeline_mode = #tpu.pipeline_mode<synchronous>, transform_indices = @transform_2, window_bounds = array<i64: 32, 1>}, {transform_indices = @transform_3, window_bounds = array<i64: 1, 1, 32, 512>}]} {
    %c0 = arith.constant 0 : index
    %c0_0 = arith.constant 0 : index
    %c0_1 = arith.constant 0 : index
    %c0_2 = arith.constant 0 : index
    %c0_3 = arith.constant 0 : index
    %0 = vector.load %arg2[%c0, %c0_0, %c0_1, %c0_2, %c0_3] : memref<1x1x6x4x110xbf16, #tpu.memory_space<vmem>>, vector<1x1x1x4x110xbf16>
    %1 = vector.shape_cast %0 : vector<1x1x1x4x110xbf16> to vector<4x110xbf16>
    %2 = vector.extract_strided_slice %1 {offsets = [0, 0], sizes = [4, 80], strides = [1, 1]} : vector<4x110xbf16> to vector<4x80xbf16>
    %c0_4 = arith.constant 0 : index
    %c0_5 = arith.constant 0 : index
    %3 = vector.load %arg6[%c0_4, %c0_5] : memref<36x768xbf16, #tpu.memory_space<vmem>>, vector<4x80xbf16>
    tpu.vector_store %arg6[%c0_4, %c0_5], %2 {strides = array<i32>} : memref<36x768xbf16, #tpu.memory_space<vmem>>, vector<4x80xbf16>,
    %4 = vector.extract_strided_slice %1 {offsets = [0, 1], sizes = [4, 80], strides = [1, 1]} : vector<4x110xbf16> to vector<4x80xbf16>
    %c4 = arith.constant 4 : index
    %c0_6 = arith.constant 0 : index
    %5 = vector.load %arg6[%c4, %c0_6] : memref<36x768xbf16, #tpu.memory_space<vmem>>, vector<4x80xbf16>
    tpu.vector_store %arg6[%c4, %c0_6], %4 {strides = array<i32>} : memref<36x768xbf16, #tpu.memory_space<vmem>>, vector<4x80xbf16>,
    %6 = vector.extract_strided_slice %1 {offsets = [0, 2], sizes = [4, 80], strides = [1, 1]} : vector<4x110xbf16> to vector<4x80xbf16>
    %c8 = arith.constant 8 : index
    %c0_7 = arith.constant 0 : index
    %7 = vector.load %arg6[%c8, %c0_7] : memref<36x768xbf16, #tpu.memory_space<vmem>>, vector<4x80xbf16>
    tpu.vector_store %arg6[%c8, %c0_7], %6 {strides = array<i32>} : memref<36x768xbf16, #tpu.memory_space<vmem>>, vector<4x80xbf16>,
    %8 = vector.extract_strided_slice %1 {offsets = [0, 10], sizes = [4, 80], strides = [1, 1]} : vector<4x110xbf16> to vector<4x80xbf16>
    %c12 = arith.constant 12 : index
    %c0_8 = arith.constant 0 : index
    %9 = vector.load %arg6[%c12, %c0_8] : memref<36x768xbf16, #tpu.memory_space<vmem>>, vector<4x80xbf16>
    tpu.vector_store %arg6[%c12, %c0_8], %8 {strides = array<i32>} : memref<36x768xbf16, #tpu.memory_space<vmem>>, vector<4x80xbf16>,
    %10 = vector.extract_strided_slice %1 {offsets = [0, 11], sizes = [4, 80], strides = [1, 1]} : vector<4x110xbf16> to vector<4x80xbf16>
    %c16 = arith.constant 16 : index
    %c0_9 = arith.constant 0 : index
    %11 = vector.load %arg6[%c16, %c0_9] : memref<36x768xbf16, #tpu.memory_space<vmem>>, vector<4x80xbf16>
    tpu.vector_store %arg6[%c16, %c0_9], %10 {strides = array<i32>} : memref<36x768xbf16, #tpu.memory_space<vmem>>, vector<4x80xbf16>,
    %12 = vector.extract_strided_slice %1 {offsets = [0, 12], sizes = [4, 80], strides = [1, 1]} : vector<4x110xbf16> to vector<4x80xbf16>
    %c20 = arith.constant 20 : index
    %c0_10 = arith.constant 0 : index
    %13 = vector.load %arg6[%c20, %c0_10] : memref<36x768xbf16, #tpu.memory_space<vmem>>, vector<4x80xbf16>
    tpu.vector_store %arg6[%c20, %c0_10], %12 {strides = array<i32>} : memref<36x768xbf16, #tpu.memory_space<vmem>>, vector<4x80xbf16>,
    %14 = vector.extract_strided_slice %1 {offsets = [0, 20], sizes = [4, 80], strides = [1, 1]} : vector<4x110xbf16> to vector<4x80xbf16>
    %c24 = arith.constant 24 : index
    %c0_11 = arith.constant 0 : index
    %15 = vector.load %arg6[%c24, %c0_11] : memref<36x768xbf16, #tpu.memory_space<vmem>>, vector<4x80xbf16>
    tpu.vector_store %arg6[%c24, %c0_11], %14 {strides = array<i32>} : memref<36x768xbf16, #tpu.memory_space<vmem>>, vector<4x80xbf16>,
    %16 = vector.extract_strided_slice %1 {offsets = [0, 21], sizes = [4, 80], strides = [1, 1]} : vector<4x110xbf16> to vector<4x80xbf16>
    %c28 = arith.constant 28 : index
    %c0_12 = arith.constant 0 : index
    %17 = vector.load %arg6[%c28, %c0_12] : memref<36x768xbf16, #tpu.memory_space<vmem>>, vector<4x80xbf16>
    tpu.vector_store %arg6[%c28, %c0_12], %16 {strides = array<i32>} : memref<36x768xbf16, #tpu.memory_space<vmem>>, vector<4x80xbf16>,
    %18 = vector.extract_strided_slice %1 {offsets = [0, 22], sizes = [4, 80], strides = [1, 1]} : vector<4x110xbf16> to vector<4x80xbf16>
    %c32 = arith.constant 32 : index
    %c0_13 = arith.constant 0 : index
    %19 = vector.load %arg6[%c32, %c0_13] : memref<36x768xbf16, #tpu.memory_space<vmem>>, vector<4x80xbf16>
    tpu.vector_store %arg6[%c32, %c0_13], %18 {strides = array<i32>} : memref<36x768xbf16, #tpu.memory_space<vmem>>, vector<4x80xbf16>,
    %c0_14 = arith.constant 0 : index
    %c0_15 = arith.constant 0 : index
    %c1 = arith.constant 1 : index
    %c0_16 = arith.constant 0 : index
    %c0_17 = arith.constant 0 : index
    %20 = vector.load %arg2[%c0_14, %c0_15, %c1, %c0_16, %c0_17] : memref<1x1x6x4x110xbf16, #tpu.memory_space<vmem>>, vector<1x1x1x4x110xbf16>
    %21 = vector.shape_cast %20 : vector<1x1x1x4x110xbf16> to vector<4x110xbf16>
    %22 = vector.extract_strided_slice %21 {offsets = [0, 0], sizes = [4, 80], strides = [1, 1]} : vector<4x110xbf16> to vector<4x80xbf16>
    %c0_18 = arith.constant 0 : index
    %c128 = arith.constant 128 : index
    %23 = vector.load %arg6[%c0_18, %c128] : memref<36x768xbf16, #tpu.memory_space<vmem>>, vector<4x80xbf16>
    tpu.vector_store %arg6[%c0_18, %c128], %22 {strides = array<i32>} : memref<36x768xbf16, #tpu.memory_space<vmem>>, vector<4x80xbf16>,
    %24 = vector.extract_strided_slice %21 {offsets = [0, 1], sizes = [4, 80], strides = [1, 1]} : vector<4x110xbf16> to vector<4x80xbf16>
    %c4_19 = arith.constant 4 : index
    %c128_20 = arith.constant 128 : index
    %25 = vector.load %arg6[%c4_19, %c128_20] : memref<36x768xbf16, #tpu.memory_space<vmem>>, vector<4x80xbf16>
    tpu.vector_store %arg6[%c4_19, %c128_20], %24 {strides = array<i32>} : memref<36x768xbf16, #tpu.memory_space<vmem>>, vector<4x80xbf16>,
    %26 = vector.extract_strided_slice %21 {offsets = [0, 2], sizes = [4, 80], strides = [1, 1]} : vector<4x110xbf16> to vector<4x80xbf16>
    %c8_21 = arith.constant 8 : index
    %c128_22 = arith.constant 128 : index
    %27 = vector.load %arg6[%c8_21, %c128_22] : memref<36x768xbf16, #tpu.memory_space<vmem>>, vector<4x80xbf16>
    tpu.vector_store %arg6[%c8_21, %c128_22], %26 {strides = array<i32>} : memref<36x768xbf16, #tpu.memory_space<vmem>>, vector<4x80xbf16>,
    %28 = vector.extract_strided_slice %21 {offsets = [0, 10], sizes = [4, 80], strides = [1, 1]} : vector<4x110xbf16> to vector<4x80xbf16>
    %c12_23 = arith.constant 12 : index
    %c128_24 = arith.constant 128 : index
    %29 = vector.load %arg6[%c12_23, %c128_24] : memref<36x768xbf16, #tpu.memory_space<vmem>>, vector<4x80xbf16>
    tpu.vector_store %arg6[%c12_23, %c128_24], %28 {strides = array<i32>} : memref<36x768xbf16, #tpu.memory_space<vmem>>, vector<4x80xbf16>,
    %30 = vector.extract_strided_slice %21 {offsets = [0, 11], sizes = [4, 80], strides = [1, 1]} : vector<4x110xbf16> to vector<4x80xbf16>
    %c16_25 = arith.constant 16 : index
    %c128_26 = arith.constant 128 : index
    %31 = vector.load %arg6[%c16_25, %c128_26] : memref<36x768xbf16, #tpu.memory_space<vmem>>, vector<4x80xbf16>
    tpu.vector_store %arg6[%c16_25, %c128_26], %30 {strides = array<i32>} : memref<36x768xbf16, #tpu.memory_space<vmem>>, vector<4x80xbf16>,
    %32 = vector.extract_strided_slice %21 {offsets = [0, 12], sizes = [4, 80], strides = [1, 1]} : vector<4x110xbf16> to vector<4x80xbf16>
    %c20_27 = arith.constant 20 : index
    %c128_28 = arith.constant 128 : index
    %33 = vector.load %arg6[%c20_27, %c128_28] : memref<36x768xbf16, #tpu.memory_space<vmem>>, vector<4x80xbf16>
    tpu.vector_store %arg6[%c20_27, %c128_28], %32 {strides = array<i32>} : memref<36x768xbf16, #tpu.memory_space<vmem>>, vector<4x80xbf16>,
    %34 = vector.extract_strided_slice %21 {offsets = [0, 20], sizes = [4, 80], strides = [1, 1]} : vector<4x110xbf16> to vector<4x80xbf16>
    %c24_29 = arith.constant 24 : index
    %c128_30 = arith.constant 128 : index
    %35 = vector.load %arg6[%c24_29, %c128_30] : memref<36x768xbf16, #tpu.memory_space<vmem>>, vector<4x80xbf16>
    tpu.vector_store %arg6[%c24_29, %c128_30], %34 {strides = array<i32>} : memref<36x768xbf16, #tpu.memory_space<vmem>>, vector<4x80xbf16>,
    %36 = vector.extract_strided_slice %21 {offsets = [0, 21], sizes = [4, 80], strides = [1, 1]} : vector<4x110xbf16> to vector<4x80xbf16>
    %c28_31 = arith.constant 28 : index
    %c128_32 = arith.constant 128 : index
    %37 = vector.load %arg6[%c28_31, %c128_32] : memref<36x768xbf16, #tpu.memory_space<vmem>>, vector<4x80xbf16>
    tpu.vector_store %arg6[%c28_31, %c128_32], %36 {strides = array<i32>} : memref<36x768xbf16, #tpu.memory_space<vmem>>, vector<4x80xbf16>,
    %38 = vector.extract_strided_slice %21 {offsets = [0, 22], sizes = [4, 80], strides = [1, 1]} : vector<4x110xbf16> to vector<4x80xbf16>
    %c32_33 = arith.constant 32 : index
    %c128_34 = arith.constant 128 : index
    %39 = vector.load %arg6[%c32_33, %c128_34] : memref<36x768xbf16, #tpu.memory_space<vmem>>, vector<4x80xbf16>
    tpu.vector_store %arg6[%c32_33, %c128_34], %38 {strides = array<i32>} : memref<36x768xbf16, #tpu.memory_space<vmem>>, vector<4x80xbf16>,
    %c0_35 = arith.constant 0 : index
    %c0_36 = arith.constant 0 : index
    %c2 = arith.constant 2 : index
    %c0_37 = arith.constant 0 : index
    %c0_38 = arith.constant 0 : index
    %40 = vector.load %arg2[%c0_35, %c0_36, %c2, %c0_37, %c0_38] : memref<1x1x6x4x110xbf16, #tpu.memory_space<vmem>>, vector<1x1x1x4x110xbf16>
    %41 = vector.shape_cast %40 : vector<1x1x1x4x110xbf16> to vector<4x110xbf16>
    %42 = vector.extract_strided_slice %41 {offsets = [0, 0], sizes = [4, 80], strides = [1, 1]} : vector<4x110xbf16> to vector<4x80xbf16>
    %c0_39 = arith.constant 0 : index
    %c256 = arith.constant 256 : index
    %43 = vector.load %arg6[%c0_39, %c256] : memref<36x768xbf16, #tpu.memory_space<vmem>>, vector<4x80xbf16>
    tpu.vector_store %arg6[%c0_39, %c256], %42 {strides = array<i32>} : memref<36x768xbf16, #tpu.memory_space<vmem>>, vector<4x80xbf16>,
    %44 = vector.extract_strided_slice %41 {offsets = [0, 1], sizes = [4, 80], strides = [1, 1]} : vector<4x110xbf16> to vector<4x80xbf16>
    %c4_40 = arith.constant 4 : index
    %c256_41 = arith.constant 256 : index
    %45 = vector.load %arg6[%c4_40, %c256_41] : memref<36x768xbf16, #tpu.memory_space<vmem>>, vector<4x80xbf16>
    tpu.vector_store %arg6[%c4_40, %c256_41], %44 {strides = array<i32>} : memref<36x768xbf16, #tpu.memory_space<vmem>>, vector<4x80xbf16>,
    %46 = vector.extract_strided_slice %41 {offsets = [0, 2], sizes = [4, 80], strides = [1, 1]} : vector<4x110xbf16> to vector<4x80xbf16>
    %c8_42 = arith.constant 8 : index
    %c256_43 = arith.constant 256 : index
    %47 = vector.load %arg6[%c8_42, %c256_43] : memref<36x768xbf16, #tpu.memory_space<vmem>>, vector<4x80xbf16>
    tpu.vector_store %arg6[%c8_42, %c256_43], %46 {strides = array<i32>} : memref<36x768xbf16, #tpu.memory_space<vmem>>, vector<4x80xbf16>,
    %48 = vector.extract_strided_slice %41 {offsets = [0, 10], sizes = [4, 80], strides = [1, 1]} : vector<4x110xbf16> to vector<4x80xbf16>
    %c12_44 = arith.constant 12 : index
    %c256_45 = arith.constant 256 : index
    %49 = vector.load %arg6[%c12_44, %c256_45] : memref<36x768xbf16, #tpu.memory_space<vmem>>, vector<4x80xbf16>
    tpu.vector_store %arg6[%c12_44, %c256_45], %48 {strides = array<i32>} : memref<36x768xbf16, #tpu.memory_space<vmem>>, vector<4x80xbf16>,
    %50 = vector.extract_strided_slice %41 {offsets = [0, 11], sizes = [4, 80], strides = [1, 1]} : vector<4x110xbf16> to vector<4x80xbf16>
    %c16_46 = arith.constant 16 : index
    %c256_47 = arith.constant 256 : index
    %51 = vector.load %arg6[%c16_46, %c256_47] : memref<36x768xbf16, #tpu.memory_space<vmem>>, vector<4x80xbf16>
    tpu.vector_store %arg6[%c16_46, %c256_47], %50 {strides = array<i32>} : memref<36x768xbf16, #tpu.memory_space<vmem>>, vector<4x80xbf16>,
    %52 = vector.extract_strided_slice %41 {offsets = [0, 12], sizes = [4, 80], strides = [1, 1]} : vector<4x110xbf16> to vector<4x80xbf16>
    %c20_48 = arith.constant 20 : index
    %c256_49 = arith.constant 256 : index
    %53 = vector.load %arg6[%c20_48, %c256_49] : memref<36x768xbf16, #tpu.memory_space<vmem>>, vector<4x80xbf16>
    tpu.vector_store %arg6[%c20_48, %c256_49], %52 {strides = array<i32>} : memref<36x768xbf16, #tpu.memory_space<vmem>>, vector<4x80xbf16>,
    %54 = vector.extract_strided_slice %41 {offsets = [0, 20], sizes = [4, 80], strides = [1, 1]} : vector<4x110xbf16> to vector<4x80xbf16>
    %c24_50 = arith.constant 24 : index
    %c256_51 = arith.constant 256 : index
    %55 = vector.load %arg6[%c24_50, %c256_51] : memref<36x768xbf16, #tpu.memory_space<vmem>>, vector<4x80xbf16>
    tpu.vector_store %arg6[%c24_50, %c256_51], %54 {strides = array<i32>} : memref<36x768xbf16, #tpu.memory_space<vmem>>, vector<4x80xbf16>,
    %56 = vector.extract_strided_slice %41 {offsets = [0, 21], sizes = [4, 80], strides = [1, 1]} : vector<4x110xbf16> to vector<4x80xbf16>
    %c28_52 = arith.constant 28 : index
    %c256_53 = arith.constant 256 : index
    %57 = vector.load %arg6[%c28_52, %c256_53] : memref<36x768xbf16, #tpu.memory_space<vmem>>, vector<4x80xbf16>
    tpu.vector_store %arg6[%c28_52, %c256_53], %56 {strides = array<i32>} : memref<36x768xbf16, #tpu.memory_space<vmem>>, vector<4x80xbf16>,
    %58 = vector.extract_strided_slice %41 {offsets = [0, 22], sizes = [4, 80], strides = [1, 1]} : vector<4x110xbf16> to vector<4x80xbf16>
    %c32_54 = arith.constant 32 : index
    %c256_55 = arith.constant 256 : index
    %59 = vector.load %arg6[%c32_54, %c256_55] : memref<36x768xbf16, #tpu.memory_space<vmem>>, vector<4x80xbf16>
    tpu.vector_store %arg6[%c32_54, %c256_55], %58 {strides = array<i32>} : memref<36x768xbf16, #tpu.memory_space<vmem>>, vector<4x80xbf16>,
    %c0_56 = arith.constant 0 : index
    %c0_57 = arith.constant 0 : index
    %c3 = arith.constant 3 : index
    %c0_58 = arith.constant 0 : index
    %c0_59 = arith.constant 0 : index
    %60 = vector.load %arg2[%c0_56, %c0_57, %c3, %c0_58, %c0_59] : memref<1x1x6x4x110xbf16, #tpu.memory_space<vmem>>, vector<1x1x1x4x110xbf16>
    %61 = vector.shape_cast %60 : vector<1x1x1x4x110xbf16> to vector<4x110xbf16>
    %62 = vector.extract_strided_slice %61 {offsets = [0, 0], sizes = [4, 80], strides = [1, 1]} : vector<4x110xbf16> to vector<4x80xbf16>
    %c0_60 = arith.constant 0 : index
    %c384 = arith.constant 384 : index
    %63 = vector.load %arg6[%c0_60, %c384] : memref<36x768xbf16, #tpu.memory_space<vmem>>, vector<4x80xbf16>
    tpu.vector_store %arg6[%c0_60, %c384], %62 {strides = array<i32>} : memref<36x768xbf16, #tpu.memory_space<vmem>>, vector<4x80xbf16>,
    %64 = vector.extract_strided_slice %61 {offsets = [0, 1], sizes = [4, 80], strides = [1, 1]} : vector<4x110xbf16> to vector<4x80xbf16>
    %c4_61 = arith.constant 4 : index
    %c384_62 = arith.constant 384 : index
    %65 = vector.load %arg6[%c4_61, %c384_62] : memref<36x768xbf16, #tpu.memory_space<vmem>>, vector<4x80xbf16>
    tpu.vector_store %arg6[%c4_61, %c384_62], %64 {strides = array<i32>} : memref<36x768xbf16, #tpu.memory_space<vmem>>, vector<4x80xbf16>,
    %66 = vector.extract_strided_slice %61 {offsets = [0, 2], sizes = [4, 80], strides = [1, 1]} : vector<4x110xbf16> to vector<4x80xbf16>
    %c8_63 = arith.constant 8 : index
    %c384_64 = arith.constant 384 : index
    %67 = vector.load %arg6[%c8_63, %c384_64] : memref<36x768xbf16, #tpu.memory_space<vmem>>, vector<4x80xbf16>
    tpu.vector_store %arg6[%c8_63, %c384_64], %66 {strides = array<i32>} : memref<36x768xbf16, #tpu.memory_space<vmem>>, vector<4x80xbf16>,
    %68 = vector.extract_strided_slice %61 {offsets = [0, 10], sizes = [4, 80], strides = [1, 1]} : vector<4x110xbf16> to vector<4x80xbf16>
    %c12_65 = arith.constant 12 : index
    %c384_66 = arith.constant 384 : index
    %69 = vector.load %arg6[%c12_65, %c384_66] : memref<36x768xbf16, #tpu.memory_space<vmem>>, vector<4x80xbf16>
    tpu.vector_store %arg6[%c12_65, %c384_66], %68 {strides = array<i32>} : memref<36x768xbf16, #tpu.memory_space<vmem>>, vector<4x80xbf16>,
    %70 = vector.extract_strided_slice %61 {offsets = [0, 11], sizes = [4, 80], strides = [1, 1]} : vector<4x110xbf16> to vector<4x80xbf16>
    %c16_67 = arith.constant 16 : index
    %c384_68 = arith.constant 384 : index
    %71 = vector.load %arg6[%c16_67, %c384_68] : memref<36x768xbf16, #tpu.memory_space<vmem>>, vector<4x80xbf16>
    tpu.vector_store %arg6[%c16_67, %c384_68], %70 {strides = array<i32>} : memref<36x768xbf16, #tpu.memory_space<vmem>>, vector<4x80xbf16>,
    %72 = vector.extract_strided_slice %61 {offsets = [0, 12], sizes = [4, 80], strides = [1, 1]} : vector<4x110xbf16> to vector<4x80xbf16>
    %c20_69 = arith.constant 20 : index
    %c384_70 = arith.constant 384 : index
    %73 = vector.load %arg6[%c20_69, %c384_70] : memref<36x768xbf16, #tpu.memory_space<vmem>>, vector<4x80xbf16>
    tpu.vector_store %arg6[%c20_69, %c384_70], %72 {strides = array<i32>} : memref<36x768xbf16, #tpu.memory_space<vmem>>, vector<4x80xbf16>,
    %74 = vector.extract_strided_slice %61 {offsets = [0, 20], sizes = [4, 80], strides = [1, 1]} : vector<4x110xbf16> to vector<4x80xbf16>
    %c24_71 = arith.constant 24 : index
    %c384_72 = arith.constant 384 : index
    %75 = vector.load %arg6[%c24_71, %c384_72] : memref<36x768xbf16, #tpu.memory_space<vmem>>, vector<4x80xbf16>
    tpu.vector_store %arg6[%c24_71, %c384_72], %74 {strides = array<i32>} : memref<36x768xbf16, #tpu.memory_space<vmem>>, vector<4x80xbf16>,
    %76 = vector.extract_strided_slice %61 {offsets = [0, 21], sizes = [4, 80], strides = [1, 1]} : vector<4x110xbf16> to vector<4x80xbf16>
    %c28_73 = arith.constant 28 : index
    %c384_74 = arith.constant 384 : index
    %77 = vector.load %arg6[%c28_73, %c384_74] : memref<36x768xbf16, #tpu.memory_space<vmem>>, vector<4x80xbf16>
    tpu.vector_store %arg6[%c28_73, %c384_74], %76 {strides = array<i32>} : memref<36x768xbf16, #tpu.memory_space<vmem>>, vector<4x80xbf16>,
    %78 = vector.extract_strided_slice %61 {offsets = [0, 22], sizes = [4, 80], strides = [1, 1]} : vector<4x110xbf16> to vector<4x80xbf16>
    %c32_75 = arith.constant 32 : index
    %c384_76 = arith.constant 384 : index
    %79 = vector.load %arg6[%c32_75, %c384_76] : memref<36x768xbf16, #tpu.memory_space<vmem>>, vector<4x80xbf16>
    tpu.vector_store %arg6[%c32_75, %c384_76], %78 {strides = array<i32>} : memref<36x768xbf16, #tpu.memory_space<vmem>>, vector<4x80xbf16>,
    %c0_77 = arith.constant 0 : index
    %c0_78 = arith.constant 0 : index
    %c4_79 = arith.constant 4 : index
    %c0_80 = arith.constant 0 : index
    %c0_81 = arith.constant 0 : index
    %80 = vector.load %arg2[%c0_77, %c0_78, %c4_79, %c0_80, %c0_81] : memref<1x1x6x4x110xbf16, #tpu.memory_space<vmem>>, vector<1x1x1x4x110xbf16>
    %81 = vector.shape_cast %80 : vector<1x1x1x4x110xbf16> to vector<4x110xbf16>
    %82 = vector.extract_strided_slice %81 {offsets = [0, 0], sizes = [4, 80], strides = [1, 1]} : vector<4x110xbf16> to vector<4x80xbf16>
    %c0_82 = arith.constant 0 : index
    %c512 = arith.constant 512 : index
    %83 = vector.load %arg6[%c0_82, %c512] : memref<36x768xbf16, #tpu.memory_space<vmem>>, vector<4x80xbf16>
    tpu.vector_store %arg6[%c0_82, %c512], %82 {strides = array<i32>} : memref<36x768xbf16, #tpu.memory_space<vmem>>, vector<4x80xbf16>,
    %84 = vector.extract_strided_slice %81 {offsets = [0, 1], sizes = [4, 80], strides = [1, 1]} : vector<4x110xbf16> to vector<4x80xbf16>
    %c4_83 = arith.constant 4 : index
    %c512_84 = arith.constant 512 : index
    %85 = vector.load %arg6[%c4_83, %c512_84] : memref<36x768xbf16, #tpu.memory_space<vmem>>, vector<4x80xbf16>
    tpu.vector_store %arg6[%c4_83, %c512_84], %84 {strides = array<i32>} : memref<36x768xbf16, #tpu.memory_space<vmem>>, vector<4x80xbf16>,
    %86 = vector.extract_strided_slice %81 {offsets = [0, 2], sizes = [4, 80], strides = [1, 1]} : vector<4x110xbf16> to vector<4x80xbf16>
    %c8_85 = arith.constant 8 : index
    %c512_86 = arith.constant 512 : index
    %87 = vector.load %arg6[%c8_85, %c512_86] : memref<36x768xbf16, #tpu.memory_space<vmem>>, vector<4x80xbf16>
    tpu.vector_store %arg6[%c8_85, %c512_86], %86 {strides = array<i32>} : memref<36x768xbf16, #tpu.memory_space<vmem>>, vector<4x80xbf16>,
    %88 = vector.extract_strided_slice %81 {offsets = [0, 10], sizes = [4, 80], strides = [1, 1]} : vector<4x110xbf16> to vector<4x80xbf16>
    %c12_87 = arith.constant 12 : index
    %c512_88 = arith.constant 512 : index
    %89 = vector.load %arg6[%c12_87, %c512_88] : memref<36x768xbf16, #tpu.memory_space<vmem>>, vector<4x80xbf16>
    tpu.vector_store %arg6[%c12_87, %c512_88], %88 {strides = array<i32>} : memref<36x768xbf16, #tpu.memory_space<vmem>>, vector<4x80xbf16>,
    %90 = vector.extract_strided_slice %81 {offsets = [0, 11], sizes = [4, 80], strides = [1, 1]} : vector<4x110xbf16> to vector<4x80xbf16>
    %c16_89 = arith.constant 16 : index
    %c512_90 = arith.constant 512 : index
    %91 = vector.load %arg6[%c16_89, %c512_90] : memref<36x768xbf16, #tpu.memory_space<vmem>>, vector<4x80xbf16>
    tpu.vector_store %arg6[%c16_89, %c512_90], %90 {strides = array<i32>} : memref<36x768xbf16, #tpu.memory_space<vmem>>, vector<4x80xbf16>,
    %92 = vector.extract_strided_slice %81 {offsets = [0, 12], sizes = [4, 80], strides = [1, 1]} : vector<4x110xbf16> to vector<4x80xbf16>
    %c20_91 = arith.constant 20 : index
    %c512_92 = arith.constant 512 : index
    %93 = vector.load %arg6[%c20_91, %c512_92] : memref<36x768xbf16, #tpu.memory_space<vmem>>, vector<4x80xbf16>
    tpu.vector_store %arg6[%c20_91, %c512_92], %92 {strides = array<i32>} : memref<36x768xbf16, #tpu.memory_space<vmem>>, vector<4x80xbf16>,
    %94 = vector.extract_strided_slice %81 {offsets = [0, 20], sizes = [4, 80], strides = [1, 1]} : vector<4x110xbf16> to vector<4x80xbf16>
    %c24_93 = arith.constant 24 : index
    %c512_94 = arith.constant 512 : index
    %95 = vector.load %arg6[%c24_93, %c512_94] : memref<36x768xbf16, #tpu.memory_space<vmem>>, vector<4x80xbf16>
    tpu.vector_store %arg6[%c24_93, %c512_94], %94 {strides = array<i32>} : memref<36x768xbf16, #tpu.memory_space<vmem>>, vector<4x80xbf16>,
    %96 = vector.extract_strided_slice %81 {offsets = [0, 21], sizes = [4, 80], strides = [1, 1]} : vector<4x110xbf16> to vector<4x80xbf16>
    %c28_95 = arith.constant 28 : index
    %c512_96 = arith.constant 512 : index
    %97 = vector.load %arg6[%c28_95, %c512_96] : memref<36x768xbf16, #tpu.memory_space<vmem>>, vector<4x80xbf16>
    tpu.vector_store %arg6[%c28_95, %c512_96], %96 {strides = array<i32>} : memref<36x768xbf16, #tpu.memory_space<vmem>>, vector<4x80xbf16>,
    %98 = vector.extract_strided_slice %81 {offsets = [0, 22], sizes = [4, 80], strides = [1, 1]} : vector<4x110xbf16> to vector<4x80xbf16>
    %c32_97 = arith.constant 32 : index
    %c512_98 = arith.constant 512 : index
    %99 = vector.load %arg6[%c32_97, %c512_98] : memref<36x768xbf16, #tpu.memory_space<vmem>>, vector<4x80xbf16>
    tpu.vector_store %arg6[%c32_97, %c512_98], %98 {strides = array<i32>} : memref<36x768xbf16, #tpu.memory_space<vmem>>, vector<4x80xbf16>,
    %c0_99 = arith.constant 0 : index
    %c0_100 = arith.constant 0 : index
    %c5 = arith.constant 5 : index
    %c0_101 = arith.constant 0 : index
    %c0_102 = arith.constant 0 : index
    %100 = vector.load %arg2[%c0_99, %c0_100, %c5, %c0_101, %c0_102] : memref<1x1x6x4x110xbf16, #tpu.memory_space<vmem>>, vector<1x1x1x4x110xbf16>
    %101 = vector.shape_cast %100 : vector<1x1x1x4x110xbf16> to vector<4x110xbf16>
    %102 = vector.extract_strided_slice %101 {offsets = [0, 0], sizes = [4, 80], strides = [1, 1]} : vector<4x110xbf16> to vector<4x80xbf16>
    %c0_103 = arith.constant 0 : index
    %c640 = arith.constant 640 : index
    %103 = vector.load %arg6[%c0_103, %c640] : memref<36x768xbf16, #tpu.memory_space<vmem>>, vector<4x80xbf16>
    tpu.vector_store %arg6[%c0_103, %c640], %102 {strides = array<i32>} : memref<36x768xbf16, #tpu.memory_space<vmem>>, vector<4x80xbf16>,
    %104 = vector.extract_strided_slice %101 {offsets = [0, 1], sizes = [4, 80], strides = [1, 1]} : vector<4x110xbf16> to vector<4x80xbf16>
    %c4_104 = arith.constant 4 : index
    %c640_105 = arith.constant 640 : index
    %105 = vector.load %arg6[%c4_104, %c640_105] : memref<36x768xbf16, #tpu.memory_space<vmem>>, vector<4x80xbf16>
    tpu.vector_store %arg6[%c4_104, %c640_105], %104 {strides = array<i32>} : memref<36x768xbf16, #tpu.memory_space<vmem>>, vector<4x80xbf16>,
    %106 = vector.extract_strided_slice %101 {offsets = [0, 2], sizes = [4, 80], strides = [1, 1]} : vector<4x110xbf16> to vector<4x80xbf16>
    %c8_106 = arith.constant 8 : index
    %c640_107 = arith.constant 640 : index
    %107 = vector.load %arg6[%c8_106, %c640_107] : memref<36x768xbf16, #tpu.memory_space<vmem>>, vector<4x80xbf16>
    tpu.vector_store %arg6[%c8_106, %c640_107], %106 {strides = array<i32>} : memref<36x768xbf16, #tpu.memory_space<vmem>>, vector<4x80xbf16>,
    %108 = vector.extract_strided_slice %101 {offsets = [0, 10], sizes = [4, 80], strides = [1, 1]} : vector<4x110xbf16> to vector<4x80xbf16>
    %c12_108 = arith.constant 12 : index
    %c640_109 = arith.constant 640 : index
    %109 = vector.load %arg6[%c12_108, %c640_109] : memref<36x768xbf16, #tpu.memory_space<vmem>>, vector<4x80xbf16>
    tpu.vector_store %arg6[%c12_108, %c640_109], %108 {strides = array<i32>} : memref<36x768xbf16, #tpu.memory_space<vmem>>, vector<4x80xbf16>,
    %110 = vector.extract_strided_slice %101 {offsets = [0, 11], sizes = [4, 80], strides = [1, 1]} : vector<4x110xbf16> to vector<4x80xbf16>
    %c16_110 = arith.constant 16 : index
    %c640_111 = arith.constant 640 : index
    %111 = vector.load %arg6[%c16_110, %c640_111] : memref<36x768xbf16, #tpu.memory_space<vmem>>, vector<4x80xbf16>
    tpu.vector_store %arg6[%c16_110, %c640_111], %110 {strides = array<i32>} : memref<36x768xbf16, #tpu.memory_space<vmem>>, vector<4x80xbf16>,
    %112 = vector.extract_strided_slice %101 {offsets = [0, 12], sizes = [4, 80], strides = [1, 1]} : vector<4x110xbf16> to vector<4x80xbf16>
    %c20_112 = arith.constant 20 : index
    %c640_113 = arith.constant 640 : index
    %113 = vector.load %arg6[%c20_112, %c640_113] : memref<36x768xbf16, #tpu.memory_space<vmem>>, vector<4x80xbf16>
    tpu.vector_store %arg6[%c20_112, %c640_113], %112 {strides = array<i32>} : memref<36x768xbf16, #tpu.memory_space<vmem>>, vector<4x80xbf16>,
    %114 = vector.extract_strided_slice %101 {offsets = [0, 20], sizes = [4, 80], strides = [1, 1]} : vector<4x110xbf16> to vector<4x80xbf16>
    %c24_114 = arith.constant 24 : index
    %c640_115 = arith.constant 640 : index
    %115 = vector.load %arg6[%c24_114, %c640_115] : memref<36x768xbf16, #tpu.memory_space<vmem>>, vector<4x80xbf16>
    tpu.vector_store %arg6[%c24_114, %c640_115], %114 {strides = array<i32>} : memref<36x768xbf16, #tpu.memory_space<vmem>>, vector<4x80xbf16>,
    %116 = vector.extract_strided_slice %101 {offsets = [0, 21], sizes = [4, 80], strides = [1, 1]} : vector<4x110xbf16> to vector<4x80xbf16>
    %c28_116 = arith.constant 28 : index
    %c640_117 = arith.constant 640 : index
    %117 = vector.load %arg6[%c28_116, %c640_117] : memref<36x768xbf16, #tpu.memory_space<vmem>>, vector<4x80xbf16>
    tpu.vector_store %arg6[%c28_116, %c640_117], %116 {strides = array<i32>} : memref<36x768xbf16, #tpu.memory_space<vmem>>, vector<4x80xbf16>,
    %118 = vector.extract_strided_slice %101 {offsets = [0, 22], sizes = [4, 80], strides = [1, 1]} : vector<4x110xbf16> to vector<4x80xbf16>
    %c32_118 = arith.constant 32 : index
    %c640_119 = arith.constant 640 : index
    %119 = vector.load %arg6[%c32_118, %c640_119] : memref<36x768xbf16, #tpu.memory_space<vmem>>, vector<4x80xbf16>
    tpu.vector_store %arg6[%c32_118, %c640_119], %118 {strides = array<i32>} : memref<36x768xbf16, #tpu.memory_space<vmem>>, vector<4x80xbf16>,
    %c0_120 = arith.constant 0 : index
    %c0_121 = arith.constant 0 : index
    %c0_122 = arith.constant 0 : index
    %120 = vector.load %arg3[%c0_120, %c0_121, %c0_122] : memref<3x32x36xbf16, #tpu.memory_space<vmem>>, vector<1x32x36xbf16>
    %121 = vector.shape_cast %120 : vector<1x32x36xbf16> to vector<32x36xbf16>
    %c0_123 = arith.constant 0 : index
    %c0_124 = arith.constant 0 : index
    %122 = vector.load %arg6[%c0_123, %c0_124] : memref<36x768xbf16, #tpu.memory_space<vmem>>, vector<36x512xbf16>
    %cst = arith.constant dense<0.000000e+00> : vector<32x512xf32>
    %123 = tpu.matmul %121, %122, %cst {dimension_numbers = #tpu.dot_dimension_numbers<[1], [0], [0], [1], [0, 0, 1, 1], [], []>} : vector<32x36xbf16>, vector<36x512xbf16>, vector<32x512xf32> -> vector<32x512xf32>
    %c1_125 = arith.constant 1 : index
    %c0_126 = arith.constant 0 : index
    %c0_127 = arith.constant 0 : index
    %124 = vector.load %arg3[%c1_125, %c0_126, %c0_127] : memref<3x32x36xbf16, #tpu.memory_space<vmem>>, vector<1x32x36xbf16>
    %125 = vector.shape_cast %124 : vector<1x32x36xbf16> to vector<32x36xbf16>
    %c0_128 = arith.constant 0 : index
    %c128_129 = arith.constant 128 : index
    %126 = vector.load %arg6[%c0_128, %c128_129] : memref<36x768xbf16, #tpu.memory_space<vmem>>, vector<36x512xbf16>
    %cst_130 = arith.constant dense<0.000000e+00> : vector<32x512xf32>
    %127 = tpu.matmul %125, %126, %cst_130 {dimension_numbers = #tpu.dot_dimension_numbers<[1], [0], [0], [1], [0, 0, 1, 1], [], []>} : vector<32x36xbf16>, vector<36x512xbf16>, vector<32x512xf32> -> vector<32x512xf32>
    %128 = arith.addf %123, %127 : vector<32x512xf32>
    %c2_131 = arith.constant 2 : index
    %c0_132 = arith.constant 0 : index
    %c0_133 = arith.constant 0 : index
    %129 = vector.load %arg3[%c2_131, %c0_132, %c0_133] : memref<3x32x36xbf16, #tpu.memory_space<vmem>>, vector<1x32x36xbf16>
    %130 = vector.shape_cast %129 : vector<1x32x36xbf16> to vector<32x36xbf16>
    %c0_134 = arith.constant 0 : index
    %c256_135 = arith.constant 256 : index
    %131 = vector.load %arg6[%c0_134, %c256_135] : memref<36x768xbf16, #tpu.memory_space<vmem>>, vector<36x512xbf16>
    %cst_136 = arith.constant dense<0.000000e+00> : vector<32x512xf32>
    %132 = tpu.matmul %130, %131, %cst_136 {dimension_numbers = #tpu.dot_dimension_numbers<[1], [0], [0], [1], [0, 0, 1, 1], [], []>} : vector<32x36xbf16>, vector<36x512xbf16>, vector<32x512xf32> -> vector<32x512xf32>
    %133 = arith.addf %128, %132 : vector<32x512xf32>
    %c0_137 = arith.constant 0 : index
    %c0_138 = arith.constant 0 : index
    %134 = vector.load %arg4[%c0_137, %c0_138] : memref<32x1xf32, #tpu.memory_space<vmem>>, vector<32x1xf32>
    %135 = vector.broadcast %134 : vector<32x1xf32> to vector<32x512xf32>
    %136 = arith.addf %133, %135 : vector<32x512xf32>
    %cst_139 = arith.constant 0.000000e+00 : f32
    %137 = vector.broadcast %cst_139 : f32 to vector<32x512xf32>
    %138 = arith.cmpf oge, %136, %137 : vector<32x512xf32>
    %cst_140 = arith.constant 2.000000e-01 : f32
    %139 = vector.broadcast %cst_140 : f32 to vector<32x512xf32>
    %140 = arith.mulf %139, %136 : vector<32x512xf32>
    %141 = arith.select %138, %136, %140 : vector<32x512xi1>, vector<32x512xf32>
    %142 = arith.truncf %141 : vector<32x512xf32> to vector<32x512xbf16>
    %c0_141 = arith.constant 0 : index
    %c0_142 = arith.constant 0 : index
    %c0_143 = arith.constant 0 : index
    %c0_144 = arith.constant 0 : index
    %143 = vector.load %arg5[%c0_141, %c0_142, %c0_143, %c0_144] : memref<1x1x32x512xbf16, #tpu.memory_space<vmem>>, vector<1x1x32x512xbf16>
    %144 = vector.shape_cast %143 : vector<1x1x32x512xbf16> to vector<32x512xbf16>
    %145 = vector.shape_cast %142 : vector<32x512xbf16> to vector<1x1x32x512xbf16>
    tpu.vector_store %arg5[%c0_141, %c0_142, %c0_143, %c0_144], %145 {strides = array<i32>} : memref<1x1x32x512xbf16, #tpu.memory_space<vmem>>, vector<1x1x32x512xbf16>,
    return
  }
  func.func @transform_0(%arg0: i32, %arg1: i32) -> (i32, i32, i32, i32, i32) {
    %c0_i32 = arith.constant 0 : i32
    %c0_i32_0 = arith.constant 0 : i32
    %c0_i32_1 = arith.constant 0 : i32
    %c0_i32_2 = arith.constant 0 : i32
    return %arg0, %arg1, %c0_i32, %c0_i32_0, %c0_i32_1 : i32, i32, i32, i32, i32
  }
  func.func @transform_1(%arg0: i32, %arg1: i32) -> (i32, i32, i32) {
    %c0_i32 = arith.constant 0 : i32
    %c0_i32_0 = arith.constant 0 : i32
    %c0_i32_1 = arith.constant 0 : i32
    %c0_i32_2 = arith.constant 0 : i32
    return %c0_i32, %c0_i32_0, %c0_i32_1 : i32, i32, i32
  }
  func.func @transform_2(%arg0: i32, %arg1: i32) -> (i32, i32) {
    %c0_i32 = arith.constant 0 : i32
    %c0_i32_0 = arith.constant 0 : i32
    %c0_i32_1 = arith.constant 0 : i32
    return %c0_i32, %c0_i32_0 : i32, i32
  }
  func.func @transform_3(%arg0: i32, %arg1: i32) -> (i32, i32, i32, i32) {
    %c0_i32 = arith.constant 0 : i32
    %c0_i32_0 = arith.constant 0 : i32
    %c0_i32_1 = arith.constant 0 : i32
    return %arg0, %arg1, %c0_i32, %c0_i32_0 : i32, i32, i32, i32
  }
}

</mosaic_0001>

<bundles_post_ra>
// kernel: tpu_custom_call.1
= control target key start
LH: loop header
LB: loop body
LE: loop exit
PB: predicated region body
PF: predicated region fallthrough
CT: control target
= control target key end

     0   :  { %8 = vsyncpa [#allocation4], 0  ;;  %s2186_s0 = inlined_call_operand.vmem [shape: bf16[2,1,6,4,110], index: 0, kind: input, shape index: {}]   ;;  %s2187_s1 = inlined_call_operand.hbm [shape: bf16[3,32,36], index: 1, kind: input, shape index: {}]   ;;  %s2188_s2 = inlined_call_operand.vmem [shape: f32[32,1], index: 2, kind: input, shape index: {}]   ;;  %s2189_s3 = inlined_call_operand.hbm [shape: bf16[2,1,32,512], index: 3, kind: output, shape index: {}]  }
   0x1   :  { %9 = vsyncpa [#allocation5], 0 }
   0x2   :  { %11 = vsyncpa [#allocation5 + $0x1], 0  ;;  %s1765_s12 = smov 0   ;;  %s1767_s13 = smov 0  }
   0x3   :  { %s1769_s14 = smov 0   ;;  %s1771_s15 = smov 0  }
   0x4   :  { %s1773_s16 = smov 0   ;;  %s1775_s17 = smov 0  }
   0x5 LB: > { %s1340_s18 = sadd.s32 4294967295, %s1729_s17   ;;  %s1341_s19 = sadd.s32 4294967294, %s1729_s17   ;;  %s1729_s17 = sphi %s1775_s17, %s17_s17   ;;  %s1725_s16 = sphi %s1773_s16, %s2196_s16   ;;  %s1721_s15 = sphi %s1771_s15, %s2195_s15   ;;  %s1717_s14 = sphi %s1769_s14, %s2194_s14   ;;  %s1713_s13 = sphi %s1767_s13, %s2193_s13   ;;  %s1709_s12 = sphi %s1765_s12, %s2192_s12  }
   0x6   : > { %s29_s20 = sadd.s32 1, %s1725_s16  ;;  %s108_s21 = sadd.s32 1, %s1717_s14 }
   0x7   : > { %p31_p0 = scmp.ge.s32.totalorder %s29_s20, 2  ;;  %p118_p1 = scmp.ne.s32.totalorder %s1717_s14, %s1713_s13 }
   0x8   : > { %p119_p2 = scmp.eq.s32.totalorder %s1340_s18, 1  ;;  %p124_p3 = scmp.ne.s32.totalorder %s1713_s13, %s1709_s12 }
   0x9   : > { %s2198_s20 = smov (%p31_p0, %s29_s20), 0  ;;  %p125_p5 = scmp.eq.s32.totalorder %s1341_s19, 1 }
   0xa   : > { %p1805_p4 = por %p119_p2, %p118_p1  ;;  %s103_s23 = ssub.s32 %s1725_s16, %s2198_s20 }
   0xb   : > { %p1342_p6 = scmp.ge.s32.totalorder %s1729_s17, 1  ;;  %p106_p7 = scmp.eq.s32.totalorder %s103_s23, 0 }
   0xc   : > { %p1812_p8 = por %p125_p5, %p124_p3  ;;  %p132_p9 = scmp.lt.s32.totalorder %s1729_s17, 3 }
   0xd   : > { %s1818_s25 = scalar_select %p106_p7, %s1717_s14, %s108_s21  }
   0xe   : > { %p133_p10 = pnand %p1342_p6, %p132_p9  ;;  %p1549_p11 = scmp.eq.s32.totalorder %s1340_s18, 0 }
   0xf   : > { %s143_s28 = sshll.u32 %s2187_s1, 4  ;;  %s1731_s29 = smov [#allocation3]   ;;  %s144_s28 = int_to_ptr.hbm [resolvable:$true] %s143_s28 }
  0x10   : > { %p1541_p12 = pneg %p133_p10  ;;  %s145_s30 = sshll.u32 %s1731_s29, 4  ;;  %s146_s30 = int_to_ptr.vmem [resolvable:$true] %s145_s30 }
  0x11   : > { %s1732_s4 = smov 64   ;;  %s1733_s5 = smov 4  }
  0x12   : > { %p1542_p13 = pnand %p1549_p11, %p1541_p12  ;;  %176 = sbr.rel (%p133_p10) target bundleno = 731 (0x2db), region = 32 }
  0x14   : > { %1544 = dma.hbm_to_vmem [thread:$0]  (!%p1542_p13), %s144_s28, 768, %s146_s30, [#allocation4], %s1732_s4, %s1732_s4, %s1733_s5  }
  0x17   : > { %1700 = dma.done.wait (%p1549_p11), [#allocation4], 768  }
  0x18   : > { %1702 = vsyncadd (%p1549_p11), [#allocation4], 4294966528  ;;  %p205_p0 = scmp.lt.s32.totalorder %s1721_s15, 1  ;;  %s1734_s11 = smov 117   ;;  %vm216_vm0 = vcmask 648192   ;;  %vm226_vm1 = vcmask 650242  }
  0x19   : > { %s1735_s18 = smov 116   ;;  %s1736_s19 = smov 108   ;;  %vm696_vm2 = vcmask 1041408   ;;  %vm689_vm3 = vcmask 293888  }
  0x1a   : > { %s206_s6 = scalar_select %p205_p0, %s1721_s15, 1 }
  0x1b   : > { %s1737_s21 = smov 107   ;;  %s1738_s23 = smov 106  }
  0x1c   : > { %s1534_s7 = smul.u32 12, %s206_s6  ;;  %s1739_s26 = smov 127  }
  0x1d   : > { %s1740_s27 = smov 126   ;;  %s1741_s28 = smov 118  }
  0x1e   : > { %s1828_s10 = scalar_lea.vmem %s2186_s0, %s1534_s7  ;;  %s1667_s6 = scalar_lea.hbm %s2189_s3, 128 }
  0x1f   : > { %v1831_v0 = vld [vmem:[%s1828_s10] sm:$0x3]  ;;  %v1856_v8 = vld [vmem:[%s1828_s10 + $0x2] sm:$0x3]  ;;  %v1879_v17 = vld [vmem:[%s1828_s10 + $0x4] sm:$0x3] }
  0x20   : > { %220 = vst [vmem:[#allocation1 + $0x1] ss:$2 sm:$0xff] %v1831_v0  ;;  %v1901_v26 = vld [vmem:[%s1828_s10 + $0x6] sm:$0x3]  ;;  %v1352_v35 = vld [vmem:[%s1828_s10 + $0x8] sm:$0x3] }
  0x21   : > { %v1930_v46 = vld [vmem:[%s1828_s10 + $0xa] sm:$0x3]  ;;  %217 = vst.msk [vmem:[#allocation2] sm:$0x3] %vm216_vm0, %v1831_v0  ;;  %s202_s10 = sand.u32 1, %s1713_s13  }
  0x22   : > { %282 = vst.msk [vmem:[#allocation2 + $0x4] sm:$0x3] %vm216_vm0, %v1856_v8 }
  0x23   : > { %346 = vst.msk [vmem:[#allocation2 + $0x8] sm:$0x3] %vm216_vm0, %v1879_v17 }
  0x24   : > { %410 = vst.msk [vmem:[#allocation2 + $0xc] sm:$0x3] %vm216_vm0, %v1901_v26 }
  0x25   : > { %474 = vst.msk [vmem:[#allocation2 + $0x10] sm:$0x3] %vm216_vm0, %v1352_v35 }
  0x26   : > { %538 = vst.msk [vmem:[#allocation2 + $0x14] sm:$0x3] %vm216_vm0, %v1930_v46 }
  0x27   : > { %v1834_v1 = vld.sshfl [vmem:[#allocation1] sm:$0xff pattern:$0x75643120] }
  0x28   : > { %228 = vst [vmem:[#allocation1] ss:$2 sm:$0xff] %v1831_v0 }
  0x2f   : > { %v1837_v2 = vld.sshfl [vmem:[#allocation1] sm:$0xff pattern:$0x75643120] }
  0x30   : > { %236 = vst [vmem:[#allocation1 + $0x1] ss:$2 sm:$0xff] %v1831_v0 }
  0x37   : > { %v1840_v3 = vld.sshfl [vmem:[#allocation1] sm:$0xff pattern:$0x75643120] }
  0x38   : > { %243 = vst [vmem:[#allocation1] ss:$2 sm:$0xff] %v1831_v0 }
  0x3f   : > { %v1843_v4 = vld.sshfl [vmem:[#allocation1] sm:$0xff pattern:$0x75643120] }
  0x40   : > { %251 = vst [vmem:[#allocation1 + $0x1] ss:$2 sm:$0xff] %v1831_v0 }
  0x47   : > { %v1846_v5 = vld.sshfl [vmem:[#allocation1] sm:$0xff pattern:$0x75643120] }
  0x48   : > { %258 = vst [vmem:[#allocation1] ss:$2 sm:$0xff] %v1831_v0 }
  0x4f   : > { %v1849_v6 = vld.sshfl [vmem:[#allocation1] sm:$0xff pattern:$0x75643120] }
  0x50   : > { %266 = vst [vmem:[#allocation1 + $0x1] ss:$2 sm:$0xff] %v1831_v0 }
  0x57   : > { %v1852_v7 = vld.sshfl [vmem:[#allocation1] sm:$0xff pattern:$0x75643120] }
  0x58   : > { %273 = vst [vmem:[#allocation1] ss:$2 sm:$0xff] %v1831_v0 }
  0x5f   : > { %v1858_v9 = vld.sshfl [vmem:[#allocation1] sm:$0xff pattern:$0x75643120] }
  0x60   : > { %285 = vst [vmem:[#allocation1 + $0x1] ss:$2 sm:$0xff] %v1856_v8 }
  0x67   : > { %v1861_v10 = vld.sshfl [vmem:[#allocation1] sm:$0xff pattern:$0x75643120] }
  0x68   : > { %292 = vst [vmem:[#allocation1] ss:$2 sm:$0xff] %v1856_v8 }
  0x6f   : > { %v1864_v11 = vld.sshfl [vmem:[#allocation1] sm:$0xff pattern:$0x75643120] }
  0x70   : > { %300 = vst [vmem:[#allocation1 + $0x1] ss:$2 sm:$0xff] %v1856_v8 }
  0x77   : > { %v1867_v12 = vld.sshfl [vmem:[#allocation1] sm:$0xff pattern:$0x75643120] }
  0x78   : > { %307 = vst [vmem:[#allocation1] ss:$2 sm:$0xff] %v1856_v8 }
  0x7f   : > { %v308_v13 = vld.sshfl [vmem:[#allocation1] sm:$0xff pattern:$0x75643120] }
  0x80   : > { %315 = vst [vmem:[#allocation1 + $0x1] ss:$2 sm:$0xff] %v1856_v8  ;;  %310 = vrot.lane.b32.xlu0 %v308_v13, %s1734_s11 }
  0x87   : > { %v316_v14 = vld.sshfl [vmem:[#allocation1] sm:$0xff pattern:$0x75643120] }
  0x88   : > { %318 = vrot.lane.b32.xlu1 %v316_v14, %s1735_s18  ;;  %322 = vst [vmem:[#allocation1] ss:$2 sm:$0xff] %v1856_v8 }
  0x8f   : > { %v323_v15 = vld.sshfl [vmem:[#allocation1] sm:$0xff pattern:$0x75643120] }
  0x90   : > { %330 = vst [vmem:[#allocation1 + $0x1] ss:$2 sm:$0xff] %v1856_v8  ;;  %325 = vrot.lane.b32.xlu2 %v323_v15, %s1736_s19 }
  0x97   : > { %v331_v16 = vld.sshfl [vmem:[#allocation1] sm:$0xff pattern:$0x75643120] }
  0x98   : > { %337 = vst [vmem:[#allocation1] ss:$2 sm:$0xff] %v1856_v8  ;;  %333 = vrot.lane.b32.xlu0 %v331_v16, %s1737_s21 }
  0x9f   : > { %v338_v18 = vld.sshfl [vmem:[#allocation1] sm:$0xff pattern:$0x75643120] }
  0xa0   : > { %340 = vrot.lane.b32.xlu1 %v338_v18, %s1738_s23  ;;  %349 = vst [vmem:[#allocation1 + $0x1] ss:$2 sm:$0xff] %v1879_v17 }
  0xa7   : > { %v1883_v19 = vld.sshfl [vmem:[#allocation1] sm:$0xff pattern:$0x75643120] }
  0xa8   : > { %356 = vst [vmem:[#allocation1] ss:$2 sm:$0xff] %v1879_v17 }
  0xaf   : > { %v1886_v20 = vld.sshfl [vmem:[#allocation1] sm:$0xff pattern:$0x75643120] }
  0xb0   : > { %364 = vst [vmem:[#allocation1 + $0x1] ss:$2 sm:$0xff] %v1879_v17 }
  0xb7   : > { %v1889_v21 = vld.sshfl [vmem:[#allocation1] sm:$0xff pattern:$0x75643120] }
  0xb8   : > { %371 = vst [vmem:[#allocation1] ss:$2 sm:$0xff] %v1879_v17 }
  0xbf   : > { %v372_v22 = vld.sshfl [vmem:[#allocation1] sm:$0xff pattern:$0x75643120] }
  0xc0   : > { %374 = vrot.lane.b32.xlu1 %v372_v22, %s1734_s11  ;;  %379 = vst [vmem:[#allocation1 + $0x1] ss:$2 sm:$0xff] %v1879_v17 }
  0xc7   : > { %v380_v23 = vld.sshfl [vmem:[#allocation1] sm:$0xff pattern:$0x75643120] }
  0xc8   : > { %382 = vrot.lane.b32.xlu2 %v380_v23, %s1735_s18  ;;  %386 = vst [vmem:[#allocation1] ss:$2 sm:$0xff] %v1879_v17 }
  0xcf   : > { %v1896_v24 = vld.sshfl [vmem:[#allocation1] sm:$0xff pattern:$0x75643120] }
  0xd0   : > { %394 = vst [vmem:[#allocation1 + $0x1] ss:$2 sm:$0xff] %v1879_v17 }
  0xd7   : > { %v395_v25 = vld.sshfl [vmem:[#allocation1] sm:$0xff pattern:$0x75643120] }
  0xd8   : > { %401 = vst [vmem:[#allocation1] ss:$2 sm:$0xff] %v1879_v17 }
  0xdf   : > { %v402_v27 = vld.sshfl [vmem:[#allocation1] sm:$0xff pattern:$0x75643120] }
  0xe0   : > { %404 = vrot.lane.b32.xlu1 %v402_v27, %s1738_s23  ;;  %413 = vst [vmem:[#allocation1 + $0x1] ss:$2 sm:$0xff] %v1901_v26 }
  0xe7   : > { %v414_v28 = vld.sshfl [vmem:[#allocation1] sm:$0xff pattern:$0x75643120] }
  0xe8   : > { %420 = vst [vmem:[#allocation1] ss:$2 sm:$0xff] %v1901_v26  ;;  %416 = vrot.lane.b32.xlu0 %v414_v28, %s1739_s26 }
  0xea   : > { %v326_v44 = vpop.permute.xlu2 %325 }
  0xeb   : > { %328 = vst.msk [vmem:[#allocation2 + $0x4c] sm:$0x3] %vm216_vm0, %v326_v44 }
  0xef   : > { %v421_v29 = vld.sshfl [vmem:[#allocation1] sm:$0xff pattern:$0x75643120] }
  0xf0   : > { %428 = vst [vmem:[#allocation1 + $0x1] ss:$2 sm:$0xff] %v1901_v26  ;;  %423 = vrot.lane.b32.xlu1 %v421_v29, %s1740_s27 }
  0xf2   : > { %v311_v54 = vpop.permute.xlu0 %310 }
  0xf3   : > { %313 = vst.msk [vmem:[#allocation2 + $0x34] sm:$0x3] %vm216_vm0, %v311_v54 }
  0xf7   : > { %v429_v30 = vld.sshfl [vmem:[#allocation1] sm:$0xff pattern:$0x75643120] }
  0xf8   : > { %431 = vrot.lane.b32.xlu2 %v429_v30, %s1741_s28  ;;  %435 = vst [vmem:[#allocation1] ss:$2 sm:$0xff] %v1901_v26 }
  0xfa   : > { %v319_v45 = vpop.permute.xlu1 %318 }
  0xfb   : > { %321 = vst.msk [vmem:[#allocation2 + $0x34] sm:$0xc] %vm226_vm1, %v319_v45 }
  0xff   : > { %v436_v31 = vld.sshfl [vmem:[#allocation1] sm:$0xff pattern:$0x75643120] }
 0x100   : > { %438 = vrot.lane.b32.xlu2 %v436_v31, %s1734_s11  ;;  %443 = vst [vmem:[#allocation1 + $0x1] ss:$2 sm:$0xff] %v1901_v26 }
 0x107   : > { %v444_v32 = vld.sshfl [vmem:[#allocation1] sm:$0xff pattern:$0x75643120] }
 0x108   : > { %446 = vrot.lane.b32.xlu2 %v444_v32, %s1735_s18  ;;  %450 = vst [vmem:[#allocation1] ss:$2 sm:$0xff] %v1901_v26 }
 0x10a   : > { %v334_v59 = vpop.permute.xlu0 %333 }
 0x10b   : > { %336 = vst.msk [vmem:[#allocation2 + $0x4c] sm:$0xc] %vm226_vm1, %v334_v59 }
 0x10f   : > { %v451_v33 = vld.sshfl [vmem:[#allocation1] sm:$0xff pattern:$0x75643120] }
 0x110   : > { %453 = vrot.lane.b32.xlu0 %v451_v33, %s1736_s19  ;;  %458 = vst [vmem:[#allocation1 + $0x1] ss:$2 sm:$0xff] %v1901_v26 }
 0x112   : > { %v341_v49 = vpop.permute.xlu1 %340 }
 0x113   : > { %343 = vst.msk [vmem:[#allocation2 + $0x64] sm:$0x3] %vm216_vm0, %v341_v49 }
 0x117   : > { %v459_v34 = vld.sshfl [vmem:[#allocation1] sm:$0xff pattern:$0x75643120] }
 0x118   : > { %465 = vst [vmem:[#allocation1] ss:$2 sm:$0xff] %v1901_v26  ;;  %461 = vrot.lane.b32.xlu1 %v459_v34, %s1737_s21 }
 0x11f   : > { %v466_v36 = vld.sshfl [vmem:[#allocation1] sm:$0xff pattern:$0x75643120] }
 0x120   : > { %468 = vrot.lane.b32.xlu0 %v466_v36, %s1738_s23  ;;  %477 = vst [vmem:[#allocation1 + $0x1] ss:$2 sm:$0xff] %v1352_v35 }
 0x122   : > { %v383_v48 = vpop.permute.xlu2 %382 }
 0x123   : > { %385 = vst.msk [vmem:[#allocation2 + $0x38] sm:$0xc] %vm226_vm1, %v383_v48 }
 0x127   : > { %v478_v37 = vld.sshfl [vmem:[#allocation1] sm:$0xff pattern:$0x75643120] }
 0x128   : > { %484 = vst [vmem:[#allocation1] ss:$2 sm:$0xff] %v1352_v35  ;;  %480 = vrot.lane.b32.xlu0 %v478_v37, %s1739_s26 }
 0x12f   : > { %v485_v38 = vld.sshfl [vmem:[#allocation1] sm:$0xff pattern:$0x75643120] }
 0x130   : > { %492 = vst [vmem:[#allocation1 + $0x1] ss:$2 sm:$0xff] %v1352_v35  ;;  %487 = vrot.lane.b32.xlu1 %v485_v38, %s1740_s27 }
 0x132   : > { %v375_v52 = vpop.permute.xlu1 %374 }
 0x133   : > { %377 = vst.msk [vmem:[#allocation2 + $0x38] sm:$0x3] %vm216_vm0, %v375_v52 }
 0x137   : > { %v493_v39 = vld.sshfl [vmem:[#allocation1] sm:$0xff pattern:$0x75643120] }
 0x138   : > { %495 = vrot.lane.b32.xlu2 %v493_v39, %s1741_s28  ;;  %499 = vst [vmem:[#allocation1] ss:$2 sm:$0xff] %v1352_v35 }
 0x13f   : > { %v500_v40 = vld.sshfl [vmem:[#allocation1] sm:$0xff pattern:$0x75643120] }
 0x140   : > { %502 = vrot.lane.b32.xlu2 %v500_v40, %s1734_s11  ;;  %507 = vst [vmem:[#allocation1 + $0x1] ss:$2 sm:$0xff] %v1352_v35 }
 0x147   : > { %v508_v41 = vld.sshfl [vmem:[#allocation1] sm:$0xff pattern:$0x75643120] }
 0x148   : > { %510 = vrot.lane.b32.xlu0 %v508_v41, %s1735_s18  ;;  %514 = vst [vmem:[#allocation1] ss:$2 sm:$0xff] %v1352_v35 }
 0x14f   : > { %v515_v42 = vld.sshfl [vmem:[#allocation1] sm:$0xff pattern:$0x75643120] }
 0x150   : > { %522 = vst [vmem:[#allocation1 + $0x1] ss:$2 sm:$0xff] %v1352_v35  ;;  %517 = vrot.lane.b32.xlu1 %v515_v42, %s1736_s19 }
 0x152   : > { %v432_v51 = vpop.permute.xlu2 %431  ;;  %v405_v56 = vpop.permute.xlu1 %404 }
 0x153   : > { %434 = vst.msk [vmem:[#allocation2 + $0x24] sm:$0xc] %vm226_vm1, %v432_v51 }
 0x154   : > { %407 = vst.msk [vmem:[#allocation2 + $0x68] sm:$0x3] %vm216_vm0, %v405_v56 }
 0x157   : > { %v523_v43 = vld.sshfl [vmem:[#allocation1] sm:$0xff pattern:$0x75643120] }
 0x158   : > { %525 = vrot.lane.b32.xlu2 %v523_v43, %s1737_s21  ;;  %529 = vst [vmem:[#allocation1] ss:$2 sm:$0xff] %v1352_v35  ;;  %397 = vrot.lane.b32.xlu1 %v395_v25, %s1737_s21 }
 0x15a   : > { %v439_v55 = vpop.permute.xlu2 %438  ;;  %v417_v63 = vpop.permute.xlu0 %416 }
 0x15b   : > { %441 = vst.msk [vmem:[#allocation2 + $0x3c] sm:$0x3] %vm216_vm0, %v439_v55  ;;  %v627_v61 = vld [vmem:[#allocation2 + $0x64] sm:$0x33] }
 0x15c   : > { %v665_v62 = vunpack.c.l.b16 %v627_v61  ;;  %419 = vst.msk [vmem:[#allocation2 + $0xc] sm:$0xc] %vm226_vm1, %v417_v63 }
 0x15e   : > { %v677_v0 = vpack.c.b16 %v665_v62, %v665_v62 }
 0x15f   : > { %v530_v47 = vld.sshfl [vmem:[#allocation1] sm:$0xff pattern:$0x75643120] }
 0x160   : > { %288 = vrot.lane.b32.xlu2 %v1861_v10, %s1739_s26  ;;  %532 = vrot.lane.b32.xlu0 %v530_v47, %s1738_s23  ;;  %541 = vst [vmem:[#allocation1 + $0x1] ss:$2 sm:$0xff] %v1930_v46  ;;  %v666_v10 = vunpack.c.h.b16 %v627_v61  ;;  %v1519_v47 = vld [vmem:[#allocation2 + $0x38] sm:$0xf] }
 0x161   : > { %303 = vrot.lane.b32.xlu1 %v1867_v12, %s1741_s28 }
 0x162   : > { %v447_v58 = vpop.permute.xlu2 %446 }
 0x163   : > { %449 = vst.msk [vmem:[#allocation2 + $0x3c] sm:$0xc] %vm226_vm1, %v447_v58  ;;  %v1372_v48 = vld [vmem:[#allocation2 + $0xc] sm:$0xf] }
 0x167   : > { %v1938_v50 = vld.sshfl [vmem:[#allocation1] sm:$0xff pattern:$0x75643120] }
 0x168   : > { %548 = vst [vmem:[#allocation1] ss:$2 sm:$0xff] %v1930_v46  ;;  %352 = vrot.lane.b32.xlu2 %v1883_v19, %s1739_s26  ;;  %389 = vrot.lane.b32.xlu0 %v1896_v24, %s1736_s19 }
 0x169   : > { %367 = vrot.lane.b32.xlu1 %v1889_v21, %s1741_s28 }
 0x16a   : > { %v1388_v38 = vld [vmem:[#allocation2 + $0x3c] sm:$0xf] }
 0x16f   : > { %v1957_v53 = vld.sshfl [vmem:[#allocation1] sm:$0xff pattern:$0x75643120] }
 0x170   : > { %556 = vst [vmem:[#allocation1 + $0x1] ss:$2 sm:$0xff] %v1930_v46  ;;  %276 = vrot.lane.b32.xlu2 %v1858_v9, %s1738_s23  ;;  %295 = vrot.lane.b32.xlu0 %v1864_v11, %s1740_s27  ;;  %v678_v11 = vpack.c.b16 %v666_v10, %v666_v10 }
 0x171   : > { %254 = vrot.lane.b32.xlu1 %v1846_v5, %s1735_s18  ;;  %v1521_v5 = vld [vmem:[#allocation2 + $0x48] sm:$0xf0] }
 0x172   : > { %v701_v13 = vsel %vm696_vm2, %v678_v11, 0 }
 0x173   : > { %733 = vmatpush.bf16.msra.mxu1 %v701_v13 }
 0x177   : > { %v557_v57 = vld.sshfl [vmem:[#allocation1] sm:$0xff pattern:$0x75643120] }
 0x178   : > { %563 = vst [vmem:[#allocation1] ss:$2 sm:$0xff] %v1930_v46  ;;  %359 = vrot.lane.b32.xlu0 %v1886_v20, %s1740_s27  ;;  %261 = vrot.lane.b32.xlu2 %v1849_v6, %s1736_s19  ;;  %v698_v6 = vsel %vm696_vm2, %v677_v0, 0 }
 0x179   : > { %223 = vrot.lane.b32.xlu1 %v1834_v1, %s1739_s26  ;;  %v1380_v1 = vld [vmem:[#allocation2 + $0x34] sm:$0xf]  ;;  %714 = vmatpush.bf16.msra.mxu0 %v698_v6 }
 0x17a   : > { %v1381_v8 = vor.u32 %v1521_v5, %v1380_v1  ;;  %v1513_v1 = vld [vmem:[#allocation3 + $0x10] sm:$0xff] }
 0x17d   : > { %715 = vmatpush.bf16.msra.mxu0 %v1381_v8 }
 0x17f   : > { %v564_v60 = vld.sshfl [vmem:[#allocation1] sm:$0xff pattern:$0x75643120] }
 0x180   : > { %571 = vst [vmem:[#allocation1 + $0x1] ss:$2 sm:$0xff] %v1930_v46  ;;  %246 = vrot.lane.b32.xlu0 %v1843_v4, %s1734_s11  ;;  %231 = vrot.lane.b32.xlu2 %v1837_v2, %s1740_s27  ;;  %v424_v4 = vpop.permute.xlu1 %423 }
 0x181   : > { %426 = vst.msk [vmem:[#allocation2 + $0x24] sm:$0x3] %vm216_vm0, %v424_v4 }
 0x182   : > { %v454_v2 = vpop.permute.xlu0 %453 }
 0x183   : > { %456 = vst.msk [vmem:[#allocation2 + $0x54] sm:$0x3] %vm216_vm0, %v454_v2 }
 0x187   : > { %v572_v9 = vld.sshfl [vmem:[#allocation1] sm:$0xff pattern:$0x75643120] }
 0x188   : > { %578 = vst [vmem:[#allocation1] ss:$2 sm:$0xff] %v1930_v46  ;;  %269 = vrot.lane.b32.xlu0 %v1852_v7, %s1737_s21  ;;  %566 = vrot.lane.b32.xlu2 %v564_v60, %s1734_s11  ;;  %s1347_s11 = sshll.u32 %s202_s10, 6 }
 0x18a   : > { %v462_v15 = vpop.permute.xlu1 %461 }
 0x18b   : > { %464 = vst.msk [vmem:[#allocation2 + $0x54] sm:$0xc] %vm226_vm1, %v462_v15 }
 0x18f   : > { %v579_v12 = vld.sshfl [vmem:[#allocation1] sm:$0xff pattern:$0x75643120] }
 0x190   : > { %239 = vrot.lane.b32.xlu0 %v1840_v3, %s1741_s28  ;;  %586 = vst [vmem:[#allocation1 + $0x1] ss:$2 sm:$0xff] %v1930_v46 }
 0x192   : > { %v496_v7 = vpop.permute.xlu2 %495  ;;  %v469_v14 = vpop.permute.xlu0 %468  ;;  %v1522_v39 = vld [vmem:[#allocation2 + $0x50] sm:$0xf0] }
 0x193   : > { %498 = vst.msk [vmem:[#allocation2 + $0x28] sm:$0xc] %vm226_vm1, %v496_v7  ;;  %v1438_v2 = vld [vmem:[#allocation2 + $0x50] sm:$0xf0] }
 0x194   : > { %471 = vst.msk [vmem:[#allocation2 + $0x6c] sm:$0x3] %vm216_vm0, %v469_v14 }
 0x197   : > { %v587_v16 = vld.sshfl [vmem:[#allocation1] sm:$0xff pattern:$0x75643120] }
 0x198   : > { %593 = vst [vmem:[#allocation1] ss:$2 sm:$0xff] %v1930_v46  ;;  %574 = vrot.lane.b32.xlu0 %v572_v9, %s1735_s18  ;;  %589 = vrot.lane.b32.xlu2 %v587_v16, %s1737_s21  ;;  %v1510_v9 = vld [vmem:[#allocation2 + $0x3c] sm:$0xf]  ;;  %s2125_s18 = scalar_lea.vmem [#allocation6], %s1347_s11 }
 0x199   : > { %v1441_v15 = vor.u32 %v1510_v9, %v1438_v2  ;;  %v1504_v2 = vld [vmem:[#allocation3 + $0x8] sm:$0xff] }
 0x19a   : > { %v503_v3 = vpop.permute.xlu2 %502  ;;  %v481_v17 = vpop.permute.xlu0 %480 }
 0x19b   : > { %505 = vst.msk [vmem:[#allocation2 + $0x40] sm:$0x3] %vm216_vm0, %v503_v3  ;;  %v613_v35 = vld [vmem:[#allocation2 + $0x68] sm:$0x33] }
 0x19c   : > { %483 = vst.msk [vmem:[#allocation2 + $0x10] sm:$0xc] %vm226_vm1, %v481_v17  ;;  %v823_v44 = vunpack.c.l.b16 %v613_v35  ;;  %v824_v45 = vunpack.c.h.b16 %v613_v35  ;;  %v1506_v3 = vld [vmem:[#allocation2 + $0xc] sm:$0xf]  ;;  %v1422_v17 = vld [vmem:[#allocation2 + $0x20] sm:$0xf0] }
 0x19e   : > { %v835_v58 = vpack.c.b16 %v823_v44, %v823_v44  ;;  %v836_v60 = vpack.c.b16 %v824_v45, %v824_v45  ;;  %v1478_v44 = vld [vmem:[#allocation2 + $0x50] sm:$0xf0] }
 0x19f   : > { %v594_v18 = vld.sshfl [vmem:[#allocation1] sm:$0xff pattern:$0x75643120] }
 0x1a0   : > { %596 = vrot.lane.b32.xlu1 %v594_v18, %s1738_s23  ;;  %544 = vrot.lane.b32.xlu0 %v1938_v50, %s1739_s26  ;;  %v1389_v50 = vor.u32 %v1522_v39, %v1388_v38  ;;  %v858_v0 = vsel %vm696_vm2, %v835_v58, 0  ;;  %v861_v5 = vsel %vm696_vm2, %v836_v60, 0 }
 0x1a1   : > { %559 = vrot.lane.b32.xlu2 %v557_v57, %s1741_s28  ;;  %s1229_s28 = scalar_lea.sflag [#allocation5], %s202_s10 }
 0x1a2   : > { %v488_v19 = vpop.permute.xlu1 %487 }
 0x1a3   : > { %490 = vst.msk [vmem:[#allocation2 + $0x28] sm:$0x3] %vm216_vm0, %v488_v19  ;;  %v1516_v56 = vld [vmem:[#allocation2 + $0x10] sm:$0xf]  ;;  %v1425_v19 = vor.u32 %v1506_v3, %v1422_v17 }
 0x1a8   : > { %581 = vrot.lane.b32.xlu1 %v579_v12, %s1736_s19  ;;  %v1436_v12 = vld [vmem:[#allocation2 + $0x38] sm:$0xf]  ;;  %s1533_s19 = sshll.u32 %s1721_s15, 6  ;;  %s1243_s15 = sshll.u32 %s2125_s18, 4  ;;  %s1244_s15 = int_to_ptr.vmem [resolvable:$true] %s1243_s15 }
 0x1a9   : > { %s1242_s26 = scalar_lea.hbm %s2189_s3, %s1533_s19 }
 0x1aa   : > { %v1374_v57 = vld [vmem:[#allocation2 + $0x24] sm:$0xf0] }
 0x1ab   : > { %v1377_v63 = vor.u32 %v1516_v56, %v1374_v57 }
 0x1b0   : > { %551 = vrot.lane.b32.xlu1 %v1957_v53, %s1740_s27  ;;  %v1518_v53 = vld [vmem:[#allocation2 + $0x20] sm:$0xf0]  ;;  %s1245_s27 = sshll.u32 %s1242_s26, 4  ;;  %s1246_s27 = int_to_ptr.hbm [resolvable:$true] %s1245_s27 }
 0x1b1   : > { %v1373_v62 = vor.u32 %v1518_v53, %v1372_v48  ;;  %s1661_s29 = sshra.s32 %s1246_s27, 4  ;;  %s1662_s29 = int_to_ptr.hbm [resolvable:$true] %s1661_s29 }
 0x1b2   : > { %v526_v20 = vpop.permute.xlu2 %525  ;;  %s1663_s30 = scalar_lea.hbm %s1662_s29, 64  ;;  %p1668_p5 = scmp.lt.s32.totalorder %s1662_s29, %s2189_s3 }
 0x1b3   : > { %528 = vst.msk [vmem:[#allocation2 + $0x58] sm:$0xc] %vm226_vm1, %v526_v20  ;;  %p1664_p1 = scmp.ne.s32.totalorder %s1662_s29, %s1663_s30  ;;  %p1669_p6 = scmp.lt.s32.totalorder %s1667_s6, %s1663_s30 }
 0x1b5   : > { %p1665_p2 = pnand %p1664_p1, %p1805_p4  ;;  %p1670_p7 = por %p1669_p6, %p1668_p5 }
 0x1b7   : > { %p1666_p3 = pneg %p1665_p2 }
 0x1b9   : > { %p1671_p9 = pnand %p1670_p7, %p1666_p3 }
 0x1ba   : > { %v289_v21 = vpop.permute.xlu2 %288  ;;  %v511_v22 = vpop.permute.xlu0 %510 }
 0x1bb   : > { %291 = vst.msk [vmem:[#allocation2 + $0x4] sm:$0xc] %vm226_vm1, %v289_v21 }
 0x1bc   : > { %513 = vst.msk [vmem:[#allocation2 + $0x40] sm:$0xc] %vm226_vm1, %v511_v22 }
 0x1c2   : > { %v353_v23 = vpop.permute.xlu2 %352  ;;  %v518_v24 = vpop.permute.xlu1 %517  ;;  %v1364_v6 = vld [vmem:[#allocation2 + $0x4] sm:$0xf] }
 0x1c3   : > { %355 = vst.msk [vmem:[#allocation2 + $0x8] sm:$0xc] %vm226_vm1, %v353_v23  ;;  %v1520_v42 = vld [vmem:[#allocation2 + $0x40] sm:$0xf] }
 0x1c4   : > { %520 = vst.msk [vmem:[#allocation2 + $0x58] sm:$0x3] %vm216_vm0, %v518_v24  ;;  %v1484_v17 = vld [vmem:[#allocation2 + $0x40] sm:$0xf] }
 0x1ca   : > { %v277_v25 = vpop.permute.xlu2 %276  ;;  %v398_v26 = vpop.permute.xlu1 %397  ;;  %v1515_v20 = vld [vmem:[#allocation2 + $0x8] sm:$0xf] }
 0x1cb   : > { %279 = vst.msk [vmem:[#allocation2 + $0x60] sm:$0x3] %vm216_vm0, %v277_v25  ;;  %v1390_v43 = vld [vmem:[#allocation2 + $0x54] sm:$0xf0]  ;;  %v1420_v21 = vld [vmem:[#allocation2 + $0x8] sm:$0xf] }
 0x1cc   : > { %400 = vst.msk [vmem:[#allocation2 + $0x50] sm:$0xc] %vm226_vm1, %v398_v26  ;;  %v1393_v51 = vor.u32 %v1520_v42, %v1390_v43  ;;  %v1529_v43 = vld [vmem:[#allocation2 + $0x3c] sm:$0xf] }
 0x1d2   : > { %v533_v27 = vpop.permute.xlu0 %532  ;;  %v262_v29 = vpop.permute.xlu2 %261  ;;  %v612_v54 = vld [vmem:[#allocation2 + $0x60] sm:$0x33] }
 0x1d3   : > { %535 = vst.msk [vmem:[#allocation2 + $0x70] sm:$0x3] %vm216_vm0, %v533_v27  ;;  %v304_v28 = vpop.permute.xlu1 %303  ;;  %v821_v61 = vunpack.c.l.b16 %v612_v54  ;;  %v822_v18 = vunpack.c.h.b16 %v612_v54 }
 0x1d4   : > { %306 = vst.msk [vmem:[#allocation2 + $0x1c] sm:$0xc] %vm226_vm1, %v304_v28 }
 0x1d5   : > { %264 = vst.msk [vmem:[#allocation2 + $0x48] sm:$0x3] %vm216_vm0, %v262_v29  ;;  %v833_v4 = vpack.c.b16 %v821_v61, %v821_v61  ;;  %v834_v23 = vpack.c.b16 %v822_v18, %v822_v18  ;;  %v952_v29 = vld [vmem:[#allocation2 + $0x68] sm:$0x33]  ;;  %v1532_v18 = vld [vmem:[#allocation2 + $0x54] sm:$0xf0] }
 0x1d6   : > { %v990_v54 = vunpack.c.l.b16 %v952_v29 }
 0x1d7   : > { %v852_v16 = vsel %vm696_vm2, %v833_v4, 0 }
 0x1d8   : > { %v1002_v57 = vpack.c.b16 %v990_v54, %v990_v54 }
 0x1da   : > { %v390_v30 = vpop.permute.xlu0 %389  ;;  %v628_v31 = vld [vmem:[#allocation2 + $0x6c] sm:$0x33]  ;;  %v232_v46 = vpop.permute.xlu2 %231  ;;  %v1021_v61 = vsel %vm696_vm2, %v1002_v57, 0 }
 0x1db   : > { %392 = vst.msk [vmem:[#allocation2 + $0x50] sm:$0x3] %vm216_vm0, %v390_v30  ;;  %v667_v32 = vunpack.c.l.b16 %v628_v31  ;;  %v668_v33 = vunpack.c.h.b16 %v628_v31  ;;  %v368_v34 = vpop.permute.xlu1 %367  ;;  %v855_v30 = vsel %vm696_vm2, %v834_v23, 0  ;;  %v1509_v31 = vld [vmem:[#allocation2 + $0x34] sm:$0xf] }
 0x1dc   : > { %370 = vst.msk [vmem:[#allocation2 + $0x20] sm:$0xc] %vm226_vm1, %v368_v34  ;;  %v1514_v34 = vld [vmem:[#allocation3 + $0x18] sm:$0xff] }
 0x1dd   : > { %v679_v36 = vpack.c.b16 %v667_v32, %v667_v32  ;;  %v680_v37 = vpack.c.b16 %v668_v33, %v668_v33  ;;  %234 = vst.msk [vmem:[#allocation2 + $0x18] sm:$0x3] %vm216_vm0, %v232_v46  ;;  %v1430_v32 = vld [vmem:[#allocation2 + $0x48] sm:$0xf0]  ;;  %v991_v33 = vunpack.c.h.b16 %v952_v29  ;;  %v1481_v46 = vor.u32 %v1529_v43, %v1478_v44 }
 0x1de   : > { %v1433_v35 = vor.u32 %v1509_v31, %v1430_v32  ;;  %v1126_v31 = vld [vmem:[%s2188_s2 + $0x10] sm:$0xff] }
 0x1df   : > { %v704_v40 = vsel %vm696_vm2, %v679_v36, 0  ;;  %v707_v41 = vsel %vm696_vm2, %v680_v37, 0  ;;  %v1505_v37 = vld [vmem:[#allocation2 + $0x4] sm:$0xf] }
 0x1e0   : > { %752 = vmatpush.bf16.msra.mxu2 %v704_v40  ;;  %771 = vmatpush.bf16.msra.mxu3 %v707_v41  ;;  %v1003_v40 = vpack.c.b16 %v991_v33, %v991_v33 }
 0x1e2   : > { %v296_v49 = vpop.permute.xlu0 %295  ;;  %v1382_v52 = vld [vmem:[#allocation2 + $0x4c] sm:$0xf0]  ;;  %v567_v22 = vpop.permute.xlu2 %566  ;;  %v1024_v42 = vsel %vm696_vm2, %v1003_v40, 0 }
 0x1e3   : > { %298 = vst.msk [vmem:[#allocation2 + $0x1c] sm:$0x3] %vm216_vm0, %v296_v49  ;;  %v1385_v55 = vor.u32 %v1519_v47, %v1382_v52  ;;  %v255_v59 = vpop.permute.xlu1 %254  ;;  %v1512_v8 = vld [vmem:[#allocation2 + $0x4c] sm:$0xf0]  ;;  %v1525_v47 = vld [vmem:[#allocation2 + $0xc] sm:$0xf] }
 0x1e4   : > { %753 = vmatpush.bf16.msra.mxu2 %v1389_v50  ;;  %772 = vmatpush.bf16.msra.mxu3 %v1393_v51  ;;  %257 = vst.msk [vmem:[#allocation2 + $0x30] sm:$0xc] %vm226_vm1, %v255_v59  ;;  %v1437_v7 = vor.u32 %v1512_v8, %v1436_v12  ;;  %v1462_v50 = vld [vmem:[#allocation2 + $0x20] sm:$0xf0] }
 0x1e5   : > { %734 = vmatpush.bf16.msra.mxu1 %v1385_v55  ;;  %569 = vst.msk [vmem:[#allocation2 + $0x44] sm:$0x3] %vm216_vm0, %v567_v22  ;;  %v1465_v53 = vor.u32 %v1525_v47, %v1462_v50  ;;  %v1503_v55 = vld [vmem:[#allocation3] sm:$0xff] }
 0x1e8   : > { %754 = vmatpush.bf16.msra.mxu2 %v1373_v62  ;;  %773 = vmatpush.bf16.msra.mxu3 %v1377_v63  ;;  %v1531_v62 = vld [vmem:[#allocation2 + $0x4c] sm:$0xf0]  ;;  %v1476_v63 = vld [vmem:[#allocation2 + $0x38] sm:$0xf] }
 0x1ea   : > { %v360_v10 = vpop.permute.xlu0 %359  ;;  %v1517_v11 = vld [vmem:[#allocation2 + $0x18] sm:$0xf0] }
 0x1eb   : > { %362 = vst.msk [vmem:[#allocation2 + $0x20] sm:$0x3] %vm216_vm0, %v360_v10  ;;  %1398 = vmatmul.msk.bf16.vlgmr.msra.gmra.mxu2 %vm689_vm3, %v1513_v1  ;;  %1400 = vmatmul.msk.bf16.vlgmr.msra.gmra.mxu3 %vm689_vm3, %v1513_v1  ;;  %v1365_v13 = vor.u32 %v1517_v11, %v1364_v6  ;;  %v224_v14 = vpop.permute.xlu1 %223  ;;  %v1414_v38 = vld [vmem:[#allocation2 + $0x18] sm:$0xf0] }
 0x1ec   : > { %906 = vmatpush.bf16.msrb.mxu2 %v858_v0  ;;  %925 = vmatpush.bf16.msrb.mxu3 %v861_v5  ;;  %227 = vst.msk [vmem:[#allocation2] sm:$0xc] %vm226_vm1, %v224_v14  ;;  %v1417_v41 = vor.u32 %v1505_v37, %v1414_v38  ;;  %v1477_v0 = vor.u32 %v1531_v62, %v1476_v63 }
 0x1ed   : > { %716 = vmatpush.bf16.msra.mxu0 %v1365_v13  ;;  %v1124_v13 = vld [vmem:[%s2188_s2] sm:$0xff] }
 0x1f0   : > { %907 = vmatpush.bf16.msrb.mxu2 %v1437_v7  ;;  %926 = vmatpush.bf16.msrb.mxu3 %v1441_v15  ;;  %v1742_v7 = vmov 0  }
 0x1f1   : > { %868 = vmatpush.bf16.msrb.mxu0 %v852_v16  ;;  %1614 = vset.pattern.permute.xlu0 %v1742_v7 }
 0x1f2   : > { %1394 = vmatmul.msk.bf16.vlgmr.msra.gmra.mxu0 %vm689_vm3, %v1513_v1  ;;  %v247_v24 = vpop.permute.xlu0 %246  ;;  %v1366_v25 = vld [vmem:[#allocation2 + $0x1c] sm:$0xf0]  ;;  %v590_v36 = vpop.permute.xlu2 %589  ;;  %1615 = vset.pattern.permute.xlu1 %v1742_v7 }
 0x1f3   : > { %v1508_v26 = vld [vmem:[#allocation2 + $0x1c] sm:$0xf0]  ;;  %249 = vst.msk [vmem:[#allocation2 + $0x30] sm:$0x3] %vm216_vm0, %v247_v24  ;;  %v1369_v27 = vor.u32 %v1515_v20, %v1366_v25  ;;  %1130 = vperm.xlu0 %1614, %v1124_v13   ;;  %1616 = vset.pattern.permute.xlu2 %v1742_v7  ;;  %v1468_v25 = vld [vmem:[#allocation2 + $0x10] sm:$0xf] }
 0x1f4   : > { %927 = vmatpush.bf16.msrb.mxu3 %v1425_v19  ;;  %v1421_v28 = vor.u32 %v1508_v26, %v1420_v21  ;;  %592 = vst.msk [vmem:[#allocation2 + $0x5c] sm:$0xc] %vm226_vm1, %v590_v36  ;;  %v1412_v56 = vld [vmem:[#allocation2] sm:$0xf]  ;;  %v1485_v21 = vor.u32 %v1532_v18, %v1484_v17  ;;  %v1528_v26 = vld [vmem:[#allocation2 + $0x24] sm:$0xf0]  ;;  %1140 = vperm.xlu2 %1616, %v1126_v31  }
 0x1f5   : > { %735 = vmatpush.bf16.msra.mxu1 %v1369_v27  ;;  %v1527_v5 = vld [vmem:[#allocation2 + $0x1c] sm:$0xf0]  ;;  %v1469_v27 = vor.u32 %v1528_v26, %v1468_v25 }
 0x1f6   : > { %908 = vmatpush.bf16.msrb.mxu2 %v1421_v28  ;;  %v1125_v19 = vld [vmem:[%s2188_s2 + $0x8] sm:$0xff]  ;;  %v1523_v28 = vld [vmem:[#allocation3 + $0x20] sm:$0xff] }
 0x1f7   : > { %1135 = vperm.xlu1 %1615, %v1125_v19  }
 0x1f8   : > { %1396 = vmatmul.msk.bf16.vlgmr.msra.gmra.mxu1 %vm689_vm3, %v1513_v1  ;;  %v1460_v1 = vld [vmem:[#allocation2 + $0x8] sm:$0xf] }
 0x1f9   : > { %887 = vmatpush.bf16.msrb.mxu1 %v855_v30  ;;  %v1461_v9 = vor.u32 %v1527_v5, %v1460_v1  ;;  %v1127_v30 = vld [vmem:[%s2188_s2 + $0x18] sm:$0xff] }
 0x1fa   : > { %v270_v39 = vpop.permute.xlu0 %269  ;;  %v1428_v45 = vld [vmem:[#allocation2 + $0x30] sm:$0xf] }
 0x1fb   : > { %272 = vst.msk [vmem:[#allocation2 + $0x48] sm:$0xc] %vm226_vm1, %v270_v39  ;;  %1399 = vmatmul.msk.bf16.gmra.mxu2 %vm689_vm3, %v1514_v34  ;;  %1401 = vmatmul.msk.bf16.gmra.mxu3 %vm689_vm3, %v1514_v34  ;;  %v560_v48 = vpop.permute.xlu2 %559 }
 0x1fc   : > { %562 = vst.msk [vmem:[#allocation2 + $0x2c] sm:$0xc] %vm226_vm1, %v560_v48 }
 0x1fd   : > { %888 = vmatpush.bf16.msrb.mxu1 %v1433_v35 }
 0x1ff   : > { %1145 = vperm.xlu1 %1615, %v1127_v30  }
 0x201   : > { %889 = vmatpush.bf16.msrb.mxu1 %v1417_v41 }
 0x202   : > { %1395 = vmatmul.msk.bf16.gmra.mxu0 %vm689_vm3, %v1514_v34  ;;  %v240_v49 = vpop.permute.xlu0 %239  ;;  %v1511_v51 = vld [vmem:[#allocation2 + $0x44] sm:$0xf0] }
 0x203   : > { %242 = vst.msk [vmem:[#allocation2 + $0x18] sm:$0xc] %vm226_vm1, %v240_v49  ;;  %v1429_v52 = vor.u32 %v1511_v51, %v1428_v45 }
 0x205   : > { %1056 = vmatpush.bf16.msra.mxu1 %v1024_v42  ;;  %869 = vmatpush.bf16.msrb.mxu0 %v1429_v52 }
 0x208   : > { %1397 = vmatmul.msk.bf16.gmra.mxu1 %vm689_vm3, %v1514_v34  ;;  %v1524_v34 = vld [vmem:[#allocation3 + $0x28] sm:$0xff] }
 0x209   : > { %1057 = vmatpush.bf16.msra.mxu1 %v1481_v46 }
 0x20a   : > { %v1507_v58 = vld [vmem:[#allocation2 + $0x14] sm:$0xf0]  ;;  %v575_v59 = vpop.permute.xlu0 %574 }
 0x20b   : > { %1446 = vmatmul.msk.bf16.vlgmr.msrb.gmra.mxu2 %vm689_vm3, %v1503_v55  ;;  %1448 = vmatmul.msk.bf16.vlgmr.msrb.gmra.mxu3 %vm689_vm3, %v1503_v55  ;;  %v1413_v60 = vor.u32 %v1507_v58, %v1412_v56  ;;  %577 = vst.msk [vmem:[#allocation2 + $0x44] sm:$0xc] %vm226_vm1, %v575_v59 }
 0x20d   : > { %1058 = vmatpush.bf16.msra.mxu1 %v1465_v53  ;;  %870 = vmatpush.bf16.msrb.mxu0 %v1413_v60 }
 0x211   : > { %1037 = vmatpush.bf16.msra.mxu0 %v1021_v61 }
 0x212   : > { %1442 = vmatmul.msk.bf16.vlgmr.msrb.gmra.mxu0 %vm689_vm3, %v1503_v55  ;;  %v597_v6 = vpop.permute.xlu1 %596  ;;  %v545_v8 = vpop.permute.xlu0 %544  ;;  %v1530_v22 = vld [vmem:[#allocation2 + $0x44] sm:$0xf] }
 0x213   : > { %599 = vst.msk [vmem:[#allocation2 + $0x74] sm:$0x3] %vm216_vm0, %v597_v6 }
 0x214   : > { %547 = vst.msk [vmem:[#allocation2 + $0x14] sm:$0xc] %vm226_vm1, %v545_v8 }
 0x215   : > { %1038 = vmatpush.bf16.msra.mxu0 %v1477_v0 }
 0x218   : > { %1444 = vmatmul.msk.bf16.vlgmr.msrb.gmra.mxu1 %vm689_vm3, %v1503_v55 }
 0x219   : > { %1039 = vmatpush.bf16.msra.mxu0 %v1461_v9 }
 0x21a   : > { %v582_v4 = vpop.permute.xlu1 %581  ;;  %v953_v10 = vld [vmem:[#allocation2 + $0x70] sm:$0x33] }
 0x21b   : > { %584 = vst.msk [vmem:[#allocation2 + $0x5c] sm:$0x3] %vm216_vm0, %v582_v4  ;;  %1447 = vmatmul.msk.bf16.gmra.mxu2 %vm689_vm3, %v1504_v2  ;;  %1449 = vmatmul.msk.bf16.gmra.mxu3 %vm689_vm3, %v1504_v2  ;;  %v992_v11 = vunpack.c.l.b16 %v953_v10  ;;  %v993_v12 = vunpack.c.h.b16 %v953_v10  ;;  %v1526_v29 = vld [vmem:[#allocation2 + $0x14] sm:$0xf] }
 0x21d   : > { %v1004_v14 = vpack.c.b16 %v992_v11, %v992_v11  ;;  %v1005_v15 = vpack.c.b16 %v993_v12, %v993_v12 }
 0x21f   : > { %v1027_v16 = vsel %vm696_vm2, %v1004_v14, 0  ;;  %v1030_v3 = vsel %vm696_vm2, %v1005_v15, 0 }
 0x220   : > { %1075 = vmatpush.bf16.msra.mxu2 %v1027_v16  ;;  %1094 = vmatpush.bf16.msra.mxu3 %v1030_v3 }
 0x222   : > { %1443 = vmatmul.msk.bf16.gmra.mxu0 %vm689_vm3, %v1504_v2  ;;  %v552_v20 = vpop.permute.xlu1 %551  ;;  %v1486_v23 = vld [vmem:[#allocation2 + $0x58] sm:$0xf0] }
 0x223   : > { %554 = vst.msk [vmem:[#allocation2 + $0x2c] sm:$0x3] %vm216_vm0, %v552_v20  ;;  %v1489_v24 = vor.u32 %v1530_v22, %v1486_v23 }
 0x224   : > { %1076 = vmatpush.bf16.msra.mxu2 %v1485_v21 }
 0x225   : > { %1095 = vmatpush.bf16.msra.mxu3 %v1489_v24 }
 0x228   : > { %1445 = vmatmul.msk.bf16.gmra.mxu1 %vm689_vm3, %v1504_v2  ;;  %1077 = vmatpush.bf16.msra.mxu2 %v1469_v27 }
 0x22a   : > { %v1470_v32 = vld [vmem:[#allocation2 + $0x28] sm:$0xf0] }
 0x22b   : > { %1494 = vmatmul.msk.bf16.vlgmr.msra.gmra.mxu2 %vm689_vm3, %v1523_v28  ;;  %v1473_v33 = vor.u32 %v1526_v29, %v1470_v32 }
 0x22d   : > { %1096 = vmatpush.bf16.msra.mxu3 %v1473_v33 }
 0x230   : > { %1496 = vmatmul.msk.bf16.vlgmr.msra.gmra.mxu3 %vm689_vm3, %v1523_v28 }
 0x232   : > { %1490 = vmatmul.msk.bf16.vlgmr.msra.gmra.mxu0 %vm689_vm3, %v1523_v28 }
 0x238   : > { %1492 = vmatmul.msk.bf16.vlgmr.msra.gmra.mxu1 %vm689_vm3, %v1523_v28 }
 0x23b   : > { %1495 = vmatmul.msk.bf16.gmra.mxu2 %vm689_vm3, %v1524_v34 }
 0x240   : > { %1497 = vmatmul.msk.bf16.gmra.mxu3 %vm689_vm3, %v1524_v34 }
 0x242   : > { %1491 = vmatmul.msk.bf16.gmra.mxu0 %vm689_vm3, %v1524_v34 }
 0x248   : > { %1493 = vmatmul.msk.bf16.gmra.mxu1 %vm689_vm3, %v1524_v34 }
 0x265   : > { %v1131_v4 = vpop.permute.xlu0 %1130 }
 0x269   : > { %v1136_v26 = vpop.permute.xlu1 %1135 }
 0x26e   : > { %v756_v36 = vpop.f32.mrf.mxu2  ;;  %v775_v37 = vpop.f32.mrf.mxu3 }
 0x26f   : > { %v718_v35 = vpop.f32.mrf.mxu0 }
 0x275   : > { %v737_v39 = vpop.f32.mrf.mxu1 }
 0x276   : > { %v758_v40 = vpop.f32.mrf.mxu2  ;;  %v777_v41 = vpop.f32.mrf.mxu3 }
 0x277   : > { %v720_v38 = vpop.f32.mrf.mxu0 }
 0x27d   : > { %v739_v43 = vpop.f32.mrf.mxu1 }
 0x27e   : > { %v2094_v44 = vpop.f32.mrf.mxu2  ;;  %v2096_v45 = vpop.f32.mrf.mxu3 }
 0x27f   : > { %v2092_v42 = vpop.f32.mrf.mxu0 }
 0x285   : > { %v2100_v47 = vpop.f32.mrf.mxu1 }
 0x286   : > { %v2102_v48 = vpop.f32.mrf.mxu2  ;;  %v2104_v49 = vpop.f32.mrf.mxu3 }
 0x287   : > { %v2098_v46 = vpop.f32.mrf.mxu0 }
 0x28d   : > { %v2106_v50 = vpop.f32.mrf.mxu1 }
 0x28e   : > { %v910_v52 = vpop.f32.mrf.mxu2  ;;  %v929_v53 = vpop.f32.mrf.mxu3 }
 0x28f   : > { %v872_v51 = vpop.f32.mrf.mxu0  ;;  %v911_v6 = vadd.f32 %v910_v52, %v756_v36  ;;  %v930_v13 = vadd.f32 %v929_v53, %v775_v37 }
 0x290   : > { %v873_v5 = vadd.f32 %v872_v51, %v718_v35 }
 0x295   : > { %v891_v55 = vpop.f32.mrf.mxu1 }
 0x296   : > { %v912_v56 = vpop.f32.mrf.mxu2  ;;  %v931_v57 = vpop.f32.mrf.mxu3  ;;  %v892_v15 = vadd.f32 %v891_v55, %v737_v39 }
 0x297   : > { %v874_v54 = vpop.f32.mrf.mxu0  ;;  %v913_v3 = vadd.f32 %v912_v56, %v758_v40  ;;  %v932_v30 = vadd.f32 %v931_v57, %v777_v41 }
 0x298   : > { %v875_v20 = vadd.f32 %v874_v54, %v720_v38 }
 0x29d   : > { %v893_v59 = vpop.f32.mrf.mxu1 }
 0x29e   : > { %v915_v60 = vpop.f32.mrf.mxu2  ;;  %v2108_v61 = vpop.f32.mrf.mxu3  ;;  %v894_v35 = vadd.f32 %v893_v59, %v739_v43 }
 0x29f   : > { %v877_v58 = vpop.f32.mrf.mxu0  ;;  %v916_v53 = vadd.f32 %v915_v60, %v2094_v44  ;;  %v935_v60 = vadd.f32 %v2108_v61, %v2096_v45 }
 0x2a0   : > { %v878_v52 = vadd.f32 %v877_v58, %v2092_v42 }
 0x2a5   : > { %v2112_v63 = vpop.f32.mrf.mxu1 }
 0x2a6   : > { %v2114_v0 = vpop.f32.mrf.mxu2  ;;  %v2116_v1 = vpop.f32.mrf.mxu3 }
 0x2a7   : > { %v2110_v62 = vpop.f32.mrf.mxu0 }
 0x2ad   : > { %v2118_v8 = vpop.f32.mrf.mxu1 }
 0x2ae   : > { %v1079_v2 = vpop.f32.mrf.mxu2 }
 0x2af   : > { %v1041_v9 = vpop.f32.mrf.mxu0  ;;  %v1110_v11 = vadd.f32 %v1079_v2, %v911_v6 }
 0x2b0   : > { %v1108_v10 = vadd.f32 %v1041_v9, %v873_v5  ;;  %v1141_v5 = vpop.permute.xlu2 %1140 }
 0x2b1   : > { %v1150_v12 = vadd.f32 %v1131_v4, %v1110_v11 }
 0x2b2   : > { %v1148_v7 = vadd.f32 %v1131_v4, %v1108_v10 }
 0x2b3   : > { %v1098_v14 = vpop.f32.mrf.mxu3  ;;  %v1182_v17 = vmul.f32 0.2, %v1150_v12  ;;  %vm1166_vm4 = vcmp.ge.f32.partialorder %v1150_v12, 0.0 }
 0x2b4   : > { %v1111_v16 = vadd.f32 %v1098_v14, %v930_v13  ;;  %v1180_v24 = vmul.f32 0.2, %v1148_v7  ;;  %vm1164_vm6 = vcmp.ge.f32.partialorder %v1148_v7, 0.0  ;;  %v897_v14 = vadd.f32 %v2112_v63, %v2100_v47 }
 0x2b5   : > { %v1060_v19 = vpop.f32.mrf.mxu1  ;;  %v1198_v31 = vsel %vm1166_vm4, %v1150_v12, %v1182_v17  ;;  %v918_v17 = vadd.f32 %v2114_v0, %v2102_v48 }
 0x2b6   : > { %v1151_v21 = vadd.f32 %v1131_v4, %v1111_v16  ;;  %v1109_v22 = vadd.f32 %v1060_v19, %v892_v15  ;;  %v1081_v23 = vpop.f32.mrf.mxu2  ;;  %v1196_v38 = vsel %vm1164_vm6, %v1148_v7, %v1180_v24  ;;  %v1146_v24 = vpop.permute.xlu1 %1145 }
 0x2b7   : > { %v1043_v18 = vpop.f32.mrf.mxu0  ;;  %v1114_v25 = vadd.f32 %v1081_v23, %v913_v3 }
 0x2b8   : > { %vm1167_vm5 = vcmp.ge.f32.partialorder %v1151_v21, 0.0  ;;  %v1183_v27 = vmul.f32 0.2, %v1151_v21  ;;  %v1112_v28 = vadd.f32 %v1043_v18, %v875_v20  ;;  %v1149_v29 = vadd.f32 %v1131_v4, %v1109_v22 }
 0x2b9   : > { %v1154_v34 = vadd.f32 %v1136_v26, %v1114_v25  ;;  %v880_v20 = vadd.f32 %v2110_v62, %v2098_v46 }
 0x2ba   : > { %v1199_v32 = vsel %vm1167_vm5, %v1151_v21, %v1183_v27  ;;  %vm1165_vm7 = vcmp.ge.f32.partialorder %v1149_v29, 0.0  ;;  %v1181_v33 = vmul.f32 0.2, %v1149_v29  ;;  %v1152_v40 = vadd.f32 %v1136_v26, %v1112_v28 }
 0x2bb   : > { %v1213_v36 = vpack.c.bf16 %v1199_v32, %v1198_v31  ;;  %v1100_v37 = vpop.f32.mrf.mxu3  ;;  %v1186_v56 = vmul.f32 0.2, %v1154_v34  ;;  %vm1170_vm8 = vcmp.ge.f32.partialorder %v1154_v34, 0.0 }
 0x2bc   : > { %v1197_v39 = vsel %vm1165_vm7, %v1149_v29, %v1181_v33  ;;  %v1115_v51 = vadd.f32 %v1100_v37, %v932_v30  ;;  %v1184_v42 = vmul.f32 0.2, %v1152_v40  ;;  %vm1168_vm10 = vcmp.ge.f32.partialorder %v1152_v40, 0.0 }
 0x2bd   : > { %1221 = vst [vmem:[%s2125_s18 + $0x8] sm:$0xff] %v1213_v36  ;;  %v1212_v41 = vpack.c.bf16 %v1197_v39, %v1196_v38  ;;  %v1062_v55 = vpop.f32.mrf.mxu1  ;;  %v1202_v4 = vsel %vm1170_vm8, %v1154_v34, %v1186_v56  ;;  %v899_v29 = vadd.f32 %v2118_v8, %v2106_v50 }
 0x2be   : > { %v1155_v43 = vadd.f32 %v1136_v26, %v1115_v51  ;;  %v1113_v57 = vadd.f32 %v1062_v55, %v894_v35  ;;  %v1084_v59 = vpop.f32.mrf.mxu2  ;;  %v1200_v15 = vsel %vm1168_vm10, %v1152_v40, %v1184_v42 }
 0x2bf   : > { %v1046_v54 = vpop.f32.mrf.mxu0  ;;  %1220 = vst [vmem:[%s2125_s18] sm:$0xff] %v1212_v41  ;;  %v1118_v9 = vadd.f32 %v1084_v59, %v916_v53 }
 0x2c0   : > { %v1116_v6 = vadd.f32 %v1046_v54, %v878_v52  ;;  %vm1171_vm9 = vcmp.ge.f32.partialorder %v1155_v43, 0.0  ;;  %v1187_v44 = vmul.f32 0.2, %v1155_v43  ;;  %v1153_v58 = vadd.f32 %v1136_v26, %v1113_v57 }
 0x2c1   : > { %v1158_v2 = vadd.f32 %v1141_v5, %v1118_v9  ;;  %v937_v26 = vadd.f32 %v2116_v1, %v2104_v49 }
 0x2c2   : > { %v1203_v10 = vsel %vm1171_vm9, %v1155_v43, %v1187_v44  ;;  %vm1169_vm11 = vcmp.ge.f32.partialorder %v1153_v58, 0.0  ;;  %v1185_v11 = vmul.f32 0.2, %v1153_v58  ;;  %v1156_v13 = vadd.f32 %v1141_v5, %v1116_v6 }
 0x2c3   : > { %v1215_v12 = vpack.c.bf16 %v1203_v10, %v1202_v4  ;;  %v1103_v7 = vpop.f32.mrf.mxu3  ;;  %v1190_v61 = vmul.f32 0.2, %v1158_v2  ;;  %vm1174_vm12 = vcmp.ge.f32.partialorder %v1158_v2, 0.0 }
 0x2c4   : > { %v1201_v16 = vsel %vm1169_vm11, %v1153_v58, %v1185_v11  ;;  %v1119_v3 = vadd.f32 %v1103_v7, %v935_v60  ;;  %v1188_v47 = vmul.f32 0.2, %v1156_v13  ;;  %vm1172_vm14 = vcmp.ge.f32.partialorder %v1156_v13, 0.0 }
 0x2c5   : > { %1223 = vst [vmem:[%s2125_s18 + $0x18] sm:$0xff] %v1215_v12  ;;  %v1214_v45 = vpack.c.bf16 %v1201_v16, %v1200_v15  ;;  %v1065_v19 = vpop.f32.mrf.mxu1  ;;  %v1206_v27 = vsel %vm1174_vm12, %v1158_v2, %v1190_v61 }
 0x2c6   : > { %v1159_v21 = vadd.f32 %v1141_v5, %v1119_v3  ;;  %v1117_v22 = vadd.f32 %v1065_v19, %v897_v14  ;;  %v1086_v23 = vpop.f32.mrf.mxu2  ;;  %v1204_v32 = vsel %vm1172_vm14, %v1156_v13, %v1188_v47 }
 0x2c7   : > { %v1048_v18 = vpop.f32.mrf.mxu0  ;;  %1222 = vst [vmem:[%s2125_s18 + $0x10] sm:$0xff] %v1214_v45  ;;  %v1122_v63 = vadd.f32 %v1086_v23, %v918_v17 }
 0x2c8   : > { %vm1175_vm13 = vcmp.ge.f32.partialorder %v1159_v21, 0.0  ;;  %v1191_v25 = vmul.f32 0.2, %v1159_v21  ;;  %v1120_v48 = vadd.f32 %v1048_v18, %v880_v20  ;;  %v1157_v0 = vadd.f32 %v1141_v5, %v1117_v22 }
 0x2c9   : > { %v1162_v28 = vadd.f32 %v1146_v24, %v1122_v63 }
 0x2ca   : > { %v1207_v46 = vsel %vm1175_vm13, %v1159_v21, %v1191_v25  ;;  %vm1173_vm15 = vcmp.ge.f32.partialorder %v1157_v0, 0.0  ;;  %v1189_v62 = vmul.f32 0.2, %v1157_v0  ;;  %v1160_v34 = vadd.f32 %v1146_v24, %v1120_v48 }
 0x2cb   : > { %v1217_v30 = vpack.c.bf16 %v1207_v46, %v1206_v27  ;;  %v1105_v31 = vpop.f32.mrf.mxu3  ;;  %v1194_v36 = vmul.f32 0.2, %v1162_v28  ;;  %vm1178_vm0 = vcmp.ge.f32.partialorder %v1162_v28, 0.0 }
 0x2cc   : > { %v1205_v33 = vsel %vm1173_vm15, %v1157_v0, %v1189_v62  ;;  %v1123_v35 = vadd.f32 %v1105_v31, %v937_v26  ;;  %v1192_v50 = vmul.f32 0.2, %v1160_v34  ;;  %vm1176_vm2 = vcmp.ge.f32.partialorder %v1160_v34, 0.0 }
 0x2cd   : > { %1225 = vst [vmem:[%s2125_s18 + $0x28] sm:$0xff] %v1217_v30  ;;  %v1216_v49 = vpack.c.bf16 %v1205_v33, %v1204_v32  ;;  %v1067_v1 = vpop.f32.mrf.mxu1  ;;  %v1210_v40 = vsel %vm1178_vm0, %v1162_v28, %v1194_v36 }
 0x2ce   : > { %v1163_v37 = vadd.f32 %v1146_v24, %v1123_v35  ;;  %v1121_v38 = vadd.f32 %v1067_v1, %v899_v29  ;;  %v1208_v41 = vsel %vm1176_vm2, %v1160_v34, %v1192_v50 }
 0x2cf   : > { %1224 = vst [vmem:[%s2125_s18 + $0x20] sm:$0xff] %v1216_v49 }
 0x2d0   : > { %vm1179_vm1 = vcmp.ge.f32.partialorder %v1163_v37, 0.0  ;;  %v1195_v8 = vmul.f32 0.2, %v1163_v37  ;;  %v1161_v39 = vadd.f32 %v1146_v24, %v1121_v38 }
 0x2d2   : > { %v1211_v51 = vsel %vm1179_vm1, %v1163_v37, %v1195_v8  ;;  %vm1177_vm3 = vcmp.ge.f32.partialorder %v1161_v39, 0.0  ;;  %v1193_v52 = vmul.f32 0.2, %v1161_v39 }
 0x2d3   : > { %v1219_v53 = vpack.c.bf16 %v1211_v51, %v1210_v40 }
 0x2d4   : > { %v1209_v54 = vsel %vm1177_vm3, %v1161_v39, %v1193_v52 }
 0x2d5   : > { %1227 = vst [vmem:[%s2125_s18 + $0x38] sm:$0xff] %v1219_v53  ;;  %v1218_v55 = vpack.c.bf16 %v1209_v54, %v1208_v41 }
 0x2d7   : > { %1226 = vst [vmem:[%s2125_s18 + $0x30] sm:$0xff] %v1218_v55 }
 0x2d8   : > { %1674 = shalt.err (!%p1671_p9)
}
 0x2d9   : > { %s1743_s9 = smov 256   ;;  %s1744_s10 = smov 16  }
 0x2da   : > { %1539 = dma.vmem_to_hbm [thread:$0]  (%p1805_p4), %s1244_s15, 1024, %s1246_s27, %s1229_s28, %s1743_s9, %s1743_s9, %s1744_s10  }
 0x2db PF: > { %p1551_p10 = scmp.ge.s32.totalorder %s1729_s17, 2  ;;  %s1260_s11 = sand.u32 1, %s1709_s12  }
 0x2dc   : > { %s1261_s18 = scalar_lea.sflag [#allocation5], %s1260_s11 }
 0x2dd   : > { %p1546_p11 = pnand %p1551_p10, %p1812_p8 }
 0x2df   : > { %p1547_p12 = pneg %p1546_p11 }
 0x2e1   : > { %1704 = dma.done.wait (%p1547_p12), %s1261_s18, 1024  }
 0x2e2   : > { %1706 = vsyncadd (%p1547_p12), %s1261_s18, 4294966272  ;;  %s17_s17 = sadd.s32 1, %s1729_s17   ;;  %s2192_s12 = smov %s1713_s13 }
 0x2e3   : > { %p14_p13 = scmp.ge.s32.totalorder %s17_s17, 4   ;;  %s2193_s13 = smov %s1717_s14 }
 0x2e4   : > { %s2194_s14 = smov %s1818_s25  ;;  %s2195_s15 = smov %s1725_s16 }
 0x2e5   : > { %s2196_s16 = smov %s2198_s20  ;;  %16 = sbr.rel (!%p14_p13) target bundleno = 5 (0x5), region = 103 }
 0x2ea   :  { %1267 = vsyncpa [#allocation4], 1 }
 0x2eb   :  { %1269 = vsyncpa [#allocation4 + $0x1], 1 }
 0x2ec   :  { %1270 = vsyncpa [#allocation5], 1 }
 0x2ed   :  { %1272 = vsyncpa [#allocation5 + $0x1], 1 }

</bundles_post_ra>
